<compile_context>
chip_gen: v5e
topology: v5e:2x2
jax: 0.10.0
libtpu: 0.0.40
codegen_flags: <defaults>
</compile_context>

<pallas_src>
from functools import partial

import jax
import jax.numpy as jnp
import numpy as np
from jax import lax
from jax.experimental import pallas as pl
from jax.experimental.pallas import tpu as pltpu

LANES = 128  # lane width of a vreg / packed-row width


def _sigmoid(z):
    # sigmoid(z) = 1 / (1 + exp(-z)): exp lands on the EUP slot (idle here);
    # approx=False keeps full f32 accuracy and is inf-safe for large |z|.
    return pl.reciprocal(jnp.exp(-z) + 1.0, approx=False)


def tabsra_kernel(scal_ref, x_ref, wblk_ref, cbias_ref, att_ref, out_ref,
                  gated_ref, *, dim_head, chunk):
    """One grid step: a (R, 128) lane-dense packed tile of the batch.

    scal_ref : (6H + H^2 + 1,) f32 SMEM — [wq1|bq1|wk1|bk1|M(H*H)|vq|vk|c]
               (bilinear form; 1/sqrt(H) folded in at pack time)
    x_ref    : (R, 128) f32 — each row holds (128 // F) batch rows of F features
    wblk_ref : (128, 128) f32 — block-diagonal packed classifier weight
    cbias_ref: (1, 128) f32 — packed classifier bias
    att_ref  : (R, 128) f32 — attention, same packing as x
    out_ref  : (R, 128) f32 — sigmoid(logits), wrapper slices the valid lanes
    gated_ref: (R, 128) f32 VMEM scratch — att * x staged for the single matmul
    """
    H = dim_head

    # ---- Hoist every SMEM scalar read (loop-invariant) ----
    o_wq1, o_bq1, o_wk1, o_bk1 = 0, H, 2 * H, 3 * H
    o_m = 4 * H
    o_vq = o_m + H * H
    o_vk = o_vq + H
    o_c = o_vk + H
    wq1 = [scal_ref[o_wq1 + h] for h in range(H)]
    bq1 = [scal_ref[o_bq1 + h] for h in range(H)]
    wk1 = [scal_ref[o_wk1 + h] for h in range(H)]
    bk1 = [scal_ref[o_bk1 + h] for h in range(H)]
    m_bil = [[scal_ref[o_m + h * H + j] for j in range(H)] for h in range(H)]
    vq = [scal_ref[o_vq + h] for h in range(H)]
    vk = [scal_ref[o_vk + j] for j in range(H)]
    c0 = scal_ref[o_c]

    n_chunks = x_ref.shape[0] // chunk

    # ---- Elementwise SRA attention, chunked so intermediates stay in vregs ----
    @pl.loop(0, n_chunks)
    def _(step):
        rows = pl.ds(pl.multiple_of(step * chunk, chunk), chunk)
        x = x_ref[rows, :]                                    # (chunk, 128), lane-dense

        # First encoder layers: Linear(1->H) + ReLU, unrolled over H on the VPU.
        hq = [jnp.maximum(wq1[h] * x + bq1[h], 0.0) for h in range(H)]
        hk = [jnp.maximum(wk1[h] * x + bk1[h], 0.0) for h in range(H)]

        # Folded bilinear form of (Linear(H->H) on q and k, then <q,k>/sqrt(H)):
        #   dots = hq^T M hk + vq.hq + vk.hk + c    (q, k never materialized)
        dots = vk[0] * hk[0]
        for j in range(1, H):
            dots = dots + vk[j] * hk[j]
        for h in range(H):
            th = m_bil[h][0] * hk[0]
            for j in range(1, H):
                th = th + m_bil[h][j] * hk[j]
            dots = dots + hq[h] * (th + vq[h])
        dots = dots + c0

        att = _sigmoid(dots)                                  # (chunk, 128)
        att_ref[rows, :] = att.astype(att_ref.dtype)          # aligned, unmasked store
        gated_ref[rows, :] = att * x                          # stage for the matmul

    # ---- Gated classifier: ONE lane-dense MXU matmul per grid step ----
    logits = jnp.dot(gated_ref[...], wblk_ref[...],
                     preferred_element_type=jnp.float32,
                     precision=lax.Precision.HIGHEST) + cbias_ref[...]
    out_ref[...] = _sigmoid(logits).astype(out_ref.dtype)


def pack_params(params, *, dim_input, dim_output, dim_head=8):
    """One-time host-side packing / constant folding.

    Returns:
      scal  : (6H + H^2 + 1,) f32 — encoder scalars with the two H->H layers and
              the <q,k>/sqrt(H) reduction folded into a bilinear form (M, vq, vk, c).
      wblk  : (128, 128) f32 — block-diagonal classifier weight (zero padded).
      cbias : (1, 128) f32 — classifier bias tiled to the packed column layout.
    """
    H, F, O = dim_head, dim_input, dim_output
    assert LANES % F == 0, "packing requires dim_input to divide 128"
    P = LANES // F
    assert P * O <= LANES, "block-diagonal packing requires (128 // dim_input) * dim_output <= 128"
    scale = 1.0 / float(np.sqrt(H))

    wq1 = np.asarray(params["wq1"], np.float32).reshape(H)
    bq1 = np.asarray(params["bq1"], np.float32).reshape(H)
    wq2 = np.asarray(params["wq2"], np.float32).reshape(H, H)
    bq2 = np.asarray(params["bq2"], np.float32).reshape(H)
    wk1 = np.asarray(params["wk1"], np.float32).reshape(H)
    bk1 = np.asarray(params["bk1"], np.float32).reshape(H)
    wk2 = np.asarray(params["wk2"], np.float32).reshape(H, H)
    bk2 = np.asarray(params["bk2"], np.float32).reshape(H)

    # dots = hq^T M hk + vq.hq + vk.hk + c   (1/sqrt(H) folded into all terms)
    m_bil = scale * (wq2 @ wk2.T)                 # (H, H): M[h,j] = <wq2[h,:], wk2[j,:]> / sqrt(H)
    vq = scale * (wq2 @ bk2)                      # (H,)
    vk = scale * (wk2 @ bq2)                      # (H,)
    c = scale * float(bq2 @ bk2)

    scal = np.concatenate(
        [wq1, bq1, wk1, bk1, m_bil.reshape(-1), vq, vk, np.array([c], np.float32)]
    ).astype(np.float32)

    wc = np.asarray(params["wc"], np.float32).reshape(F, O)
    bc = np.asarray(params["bc"], np.float32).reshape(O)
    wblk = np.zeros((LANES, LANES), np.float32)
    cbias = np.zeros((1, LANES), np.float32)
    for b in range(P):
        wblk[b * F:(b + 1) * F, b * O:(b + 1) * O] = wc
        cbias[0, b * O:(b + 1) * O] = bc

    return jnp.asarray(scal), jnp.asarray(wblk), jnp.asarray(cbias)


def _pick_tile_rows(bp):
    """Packed rows per grid step.

    Prefer large tiles (amortize ~0.35us/step) with an even grid of >=4 steps so
    v7x's two TensorCores each get >=2 pipelined steps; accept 2 steps otherwise;
    tiny problems run as a single step (grid overhead would dominate).
    """
    for min_steps, need_even in ((4, True), (2, False)):
        for cand in (1024, 512, 256, 128):
            steps = bp // cand
            if bp % cand == 0 and steps >= min_steps and (steps % 2 == 0 or not need_even):
                return cand
    return bp


def _pick_chunk_rows(tile_rows):
    for cand in (8, 4, 2, 1):
        if tile_rows % cand == 0:
            return cand
    return 1


@partial(jax.jit, static_argnames=("dim_output", "dim_head"))
def tabsra_forward(x, scal, wblk, cbias, *, dim_output, dim_head):
    B, F = x.shape
    O = dim_output
    assert LANES % F == 0 and (B * F) % LANES == 0, "demo packing needs F | 128 and B*F % 128 == 0"
    P = LANES // F                 # batch rows packed per lane-dense row
    assert P * O <= LANES, "packed outputs (128//F * dim_output) must fit in 128 lanes"
    assert scal.shape[0] == 6 * dim_head + dim_head * dim_head + 1, "stale parameter slab layout"
    Bp = (B * F) // LANES          # number of packed rows

    R = _pick_tile_rows(Bp)
    assert R <= 4096, "single-step fallback tile too large; pick a batch with a 128/256/512/1024-row-divisible packing"
    chunk = _pick_chunk_rows(R)
    grid = (Bp // R,)

    x_packed = x.reshape(Bp, LANES)  # row-major repack; pure layout plumbing

    att_packed, out_packed = pl.pallas_call(
        partial(tabsra_kernel, dim_head=dim_head, chunk=chunk),
        grid=grid,
        in_specs=[
            pl.BlockSpec(memory_space=pltpu.MemorySpace.SMEM),   # packed encoder scalars
            pl.BlockSpec((R, LANES), lambda i: (i, 0)),          # x, lane-dense tiles
            pl.BlockSpec((LANES, LANES), lambda i: (0, 0)),      # classifier block weights
            pl.BlockSpec((1, LANES), lambda i: (0, 0)),          # packed classifier bias
        ],
        out_specs=(
            pl.BlockSpec((R, LANES), lambda i: (i, 0)),          # att (lane-dense)
            pl.BlockSpec((R, LANES), lambda i: (i, 0)),          # packed sigmoid(logits)
        ),
        out_shape=(
            jax.ShapeDtypeStruct((Bp, LANES), jnp.float32),
            jax.ShapeDtypeStruct((Bp, LANES), jnp.float32),
        ),
        scratch_shapes=[pltpu.VMEM((R, LANES), jnp.float32)],    # staged att * x
        compiler_params=pltpu.CompilerParams(
            dimension_semantics=("parallel",),   # shards the batch grid across v7x's 2 TCs
            vmem_limit_bytes=32 * 1024 * 1024,   # explicit budget; safe on v5e/v6e/v7x
        ),
    )(scal, x_packed, wblk, cbias)

    att = att_packed.reshape(B, F)
    out = out_packed[:, :P * O].reshape(B, O)
    return att, out


def tabsra_reference(x, p):
    """Pure-JAX reference of the same forward pass (for correctness check)."""
    B, F = x.shape
    H = p["wq1"].shape[1]
    hp = lax.Precision.HIGHEST
    xe = x[:, :, None]                                            # (B, F, 1)
    hq = jax.nn.relu(xe * p["wq1"][0] + p["bq1"][0])              # (B, F, H)
    q = jnp.einsum("bfh,hg->bfg", hq, p["wq2"], precision=hp) + p["bq2"][0]
    hk = jax.nn.relu(xe * p["wk1"][0] + p["bk1"][0])
    k = jnp.einsum("bfh,hg->bfg", hk, p["wk2"], precision=hp) + p["bk2"][0]
    att = jax.nn.sigmoid(jnp.sum(q * k, axis=-1) / (H ** 0.5))    # (B, F)
    logits = jnp.einsum("bf,fo->bo", att * x, p["wc"], precision=hp) + p["bc"][0]
    return att, jax.nn.sigmoid(logits)


if __name__ == "__main__":
    # Small tabular problem: batch=256, dim_input=16, dim_output=4, dim_head=8.
    B, F, O, H = 256, 16, 4, 8
    key = jax.random.PRNGKey(0)
    ks = jax.random.split(key, 12)

    x = jax.random.normal(ks[0], (B, F), jnp.float32)

    # PyTorch layouts transposed to input-major (in, out) as in the original module.
    params = dict(
        wq1=0.5 * jax.random.normal(ks[1], (1, H), jnp.float32),   # Linear(1, H).weight.T
        bq1=0.1 * jax.random.normal(ks[2], (1, H), jnp.float32),
        wq2=0.3 * jax.random.normal(ks[3], (H, H), jnp.float32),   # Linear(H, H).weight.T
        bq2=0.1 * jax.random.normal(ks[4], (1, H), jnp.float32),
        wk1=0.5 * jax.random.normal(ks[5], (1, H), jnp.float32),
        bk1=0.1 * jax.random.normal(ks[6], (1, H), jnp.float32),
        wk2=0.3 * jax.random.normal(ks[7], (H, H), jnp.float32),
        bk2=0.1 * jax.random.normal(ks[8], (1, H), jnp.float32),
        wc=0.3 * jax.random.normal(ks[9], (F, O), jnp.float32),    # classifier.weight.T
        bc=0.1 * jax.random.normal(ks[10], (1, O), jnp.float32),
    )

    scal, wblk, cbias = pack_params(params, dim_input=F, dim_output=O, dim_head=H)

    # Case 1: tiny batch (Bp=32) -> single grid step.
    att, out = tabsra_forward(x, scal, wblk, cbias, dim_output=O, dim_head=H)
    jax.block_until_ready((att, out))
    att_want, out_want = tabsra_reference(x, params)
    np.testing.assert_allclose(np.asarray(att), np.asarray(att_want), rtol=5e-5, atol=5e-5)
    np.testing.assert_allclose(np.asarray(out), np.asarray(out_want), rtol=5e-5, atol=5e-5)
    assert att.shape == (B, F) and out.shape == (B, O)

    # Case 2: larger batch (Bp=512 -> R=128, grid=(4,)) exercises the pipelined,
    # megacore-parallel grid path and the in-kernel chunk loop at depth 16.
    B2 = 4096
    x2 = jax.random.normal(ks[11], (B2, F), jnp.float32)
    att2, out2 = tabsra_forward(x2, scal, wblk, cbias, dim_output=O, dim_head=H)
    jax.block_until_ready((att2, out2))
    att2_want, out2_want = tabsra_reference(x2, params)
    np.testing.assert_allclose(np.asarray(att2), np.asarray(att2_want), rtol=5e-5, atol=5e-5)
    np.testing.assert_allclose(np.asarray(out2), np.asarray(out2_want), rtol=5e-5, atol=5e-5)

    print("KERNEL_OK")
</pallas_src>

<mosaic_0001>
module attributes {stable_mosaic.version = 11 : i64} {
  func.func @tabsra_kernel(%arg0: i32, %arg1: memref<113xf32, #tpu.memory_space<smem>>, %arg2: memref<32x128xf32, #tpu.memory_space<vmem>>, %arg3: memref<128x128xf32, #tpu.memory_space<vmem>>, %arg4: memref<1x128xf32, #tpu.memory_space<vmem>>, %arg5: memref<32x128xf32, #tpu.memory_space<vmem>>, %arg6: memref<32x128xf32, #tpu.memory_space<vmem>>, %arg7: memref<32x128xf32, #tpu.memory_space<vmem>>) attributes {dimension_semantics = [#tpu.dimension_semantics<parallel>], iteration_bounds = array<i64: 1>, scalar_prefetch = 0 : i64, scratch_operands = 1 : i64, tpu.core_type = #tpu.core_type<tc>, window_params = [{transform_indices = @transform_0, window_bounds = array<i64: 113>}, {transform_indices = @transform_1, window_bounds = array<i64: 32, 128>}, {pipeline_mode = #tpu.pipeline_mode<synchronous>, transform_indices = @transform_2, window_bounds = array<i64: 128, 128>}, {pipeline_mode = #tpu.pipeline_mode<synchronous>, transform_indices = @transform_3, window_bounds = array<i64: 1, 128>}, {transform_indices = @transform_4, window_bounds = array<i64: 32, 128>}, {transform_indices = @transform_5, window_bounds = array<i64: 32, 128>}]} {
    %c0 = arith.constant 0 : index
    %0 = memref.load %arg1[%c0] : memref<113xf32, #tpu.memory_space<smem>>
    %c1 = arith.constant 1 : index
    %1 = memref.load %arg1[%c1] : memref<113xf32, #tpu.memory_space<smem>>
    %c2 = arith.constant 2 : index
    %2 = memref.load %arg1[%c2] : memref<113xf32, #tpu.memory_space<smem>>
    %c3 = arith.constant 3 : index
    %3 = memref.load %arg1[%c3] : memref<113xf32, #tpu.memory_space<smem>>
    %c4 = arith.constant 4 : index
    %4 = memref.load %arg1[%c4] : memref<113xf32, #tpu.memory_space<smem>>
    %c5 = arith.constant 5 : index
    %5 = memref.load %arg1[%c5] : memref<113xf32, #tpu.memory_space<smem>>
    %c6 = arith.constant 6 : index
    %6 = memref.load %arg1[%c6] : memref<113xf32, #tpu.memory_space<smem>>
    %c7 = arith.constant 7 : index
    %7 = memref.load %arg1[%c7] : memref<113xf32, #tpu.memory_space<smem>>
    %c8 = arith.constant 8 : index
    %8 = memref.load %arg1[%c8] : memref<113xf32, #tpu.memory_space<smem>>
    %c9 = arith.constant 9 : index
    %9 = memref.load %arg1[%c9] : memref<113xf32, #tpu.memory_space<smem>>
    %c10 = arith.constant 10 : index
    %10 = memref.load %arg1[%c10] : memref<113xf32, #tpu.memory_space<smem>>
    %c11 = arith.constant 11 : index
    %11 = memref.load %arg1[%c11] : memref<113xf32, #tpu.memory_space<smem>>
    %c12 = arith.constant 12 : index
    %12 = memref.load %arg1[%c12] : memref<113xf32, #tpu.memory_space<smem>>
    %c13 = arith.constant 13 : index
    %13 = memref.load %arg1[%c13] : memref<113xf32, #tpu.memory_space<smem>>
    %c14 = arith.constant 14 : index
    %14 = memref.load %arg1[%c14] : memref<113xf32, #tpu.memory_space<smem>>
    %c15 = arith.constant 15 : index
    %15 = memref.load %arg1[%c15] : memref<113xf32, #tpu.memory_space<smem>>
    %c16 = arith.constant 16 : index
    %16 = memref.load %arg1[%c16] : memref<113xf32, #tpu.memory_space<smem>>
    %c17 = arith.constant 17 : index
    %17 = memref.load %arg1[%c17] : memref<113xf32, #tpu.memory_space<smem>>
    %c18 = arith.constant 18 : index
    %18 = memref.load %arg1[%c18] : memref<113xf32, #tpu.memory_space<smem>>
    %c19 = arith.constant 19 : index
    %19 = memref.load %arg1[%c19] : memref<113xf32, #tpu.memory_space<smem>>
    %c20 = arith.constant 20 : index
    %20 = memref.load %arg1[%c20] : memref<113xf32, #tpu.memory_space<smem>>
    %c21 = arith.constant 21 : index
    %21 = memref.load %arg1[%c21] : memref<113xf32, #tpu.memory_space<smem>>
    %c22 = arith.constant 22 : index
    %22 = memref.load %arg1[%c22] : memref<113xf32, #tpu.memory_space<smem>>
    %c23 = arith.constant 23 : index
    %23 = memref.load %arg1[%c23] : memref<113xf32, #tpu.memory_space<smem>>
    %c24 = arith.constant 24 : index
    %24 = memref.load %arg1[%c24] : memref<113xf32, #tpu.memory_space<smem>>
    %c25 = arith.constant 25 : index
    %25 = memref.load %arg1[%c25] : memref<113xf32, #tpu.memory_space<smem>>
    %c26 = arith.constant 26 : index
    %26 = memref.load %arg1[%c26] : memref<113xf32, #tpu.memory_space<smem>>
    %c27 = arith.constant 27 : index
    %27 = memref.load %arg1[%c27] : memref<113xf32, #tpu.memory_space<smem>>
    %c28 = arith.constant 28 : index
    %28 = memref.load %arg1[%c28] : memref<113xf32, #tpu.memory_space<smem>>
    %c29 = arith.constant 29 : index
    %29 = memref.load %arg1[%c29] : memref<113xf32, #tpu.memory_space<smem>>
    %c30 = arith.constant 30 : index
    %30 = memref.load %arg1[%c30] : memref<113xf32, #tpu.memory_space<smem>>
    %c31 = arith.constant 31 : index
    %31 = memref.load %arg1[%c31] : memref<113xf32, #tpu.memory_space<smem>>
    %c32 = arith.constant 32 : index
    %32 = memref.load %arg1[%c32] : memref<113xf32, #tpu.memory_space<smem>>
    %c33 = arith.constant 33 : index
    %33 = memref.load %arg1[%c33] : memref<113xf32, #tpu.memory_space<smem>>
    %c34 = arith.constant 34 : index
    %34 = memref.load %arg1[%c34] : memref<113xf32, #tpu.memory_space<smem>>
    %c35 = arith.constant 35 : index
    %35 = memref.load %arg1[%c35] : memref<113xf32, #tpu.memory_space<smem>>
    %c36 = arith.constant 36 : index
    %36 = memref.load %arg1[%c36] : memref<113xf32, #tpu.memory_space<smem>>
    %c37 = arith.constant 37 : index
    %37 = memref.load %arg1[%c37] : memref<113xf32, #tpu.memory_space<smem>>
    %c38 = arith.constant 38 : index
    %38 = memref.load %arg1[%c38] : memref<113xf32, #tpu.memory_space<smem>>
    %c39 = arith.constant 39 : index
    %39 = memref.load %arg1[%c39] : memref<113xf32, #tpu.memory_space<smem>>
    %c40 = arith.constant 40 : index
    %40 = memref.load %arg1[%c40] : memref<113xf32, #tpu.memory_space<smem>>
    %c41 = arith.constant 41 : index
    %41 = memref.load %arg1[%c41] : memref<113xf32, #tpu.memory_space<smem>>
    %c42 = arith.constant 42 : index
    %42 = memref.load %arg1[%c42] : memref<113xf32, #tpu.memory_space<smem>>
    %c43 = arith.constant 43 : index
    %43 = memref.load %arg1[%c43] : memref<113xf32, #tpu.memory_space<smem>>
    %c44 = arith.constant 44 : index
    %44 = memref.load %arg1[%c44] : memref<113xf32, #tpu.memory_space<smem>>
    %c45 = arith.constant 45 : index
    %45 = memref.load %arg1[%c45] : memref<113xf32, #tpu.memory_space<smem>>
    %c46 = arith.constant 46 : index
    %46 = memref.load %arg1[%c46] : memref<113xf32, #tpu.memory_space<smem>>
    %c47 = arith.constant 47 : index
    %47 = memref.load %arg1[%c47] : memref<113xf32, #tpu.memory_space<smem>>
    %c48 = arith.constant 48 : index
    %48 = memref.load %arg1[%c48] : memref<113xf32, #tpu.memory_space<smem>>
    %c49 = arith.constant 49 : index
    %49 = memref.load %arg1[%c49] : memref<113xf32, #tpu.memory_space<smem>>
    %c50 = arith.constant 50 : index
    %50 = memref.load %arg1[%c50] : memref<113xf32, #tpu.memory_space<smem>>
    %c51 = arith.constant 51 : index
    %51 = memref.load %arg1[%c51] : memref<113xf32, #tpu.memory_space<smem>>
    %c52 = arith.constant 52 : index
    %52 = memref.load %arg1[%c52] : memref<113xf32, #tpu.memory_space<smem>>
    %c53 = arith.constant 53 : index
    %53 = memref.load %arg1[%c53] : memref<113xf32, #tpu.memory_space<smem>>
    %c54 = arith.constant 54 : index
    %54 = memref.load %arg1[%c54] : memref<113xf32, #tpu.memory_space<smem>>
    %c55 = arith.constant 55 : index
    %55 = memref.load %arg1[%c55] : memref<113xf32, #tpu.memory_space<smem>>
    %c56 = arith.constant 56 : index
    %56 = memref.load %arg1[%c56] : memref<113xf32, #tpu.memory_space<smem>>
    %c57 = arith.constant 57 : index
    %57 = memref.load %arg1[%c57] : memref<113xf32, #tpu.memory_space<smem>>
    %c58 = arith.constant 58 : index
    %58 = memref.load %arg1[%c58] : memref<113xf32, #tpu.memory_space<smem>>
    %c59 = arith.constant 59 : index
    %59 = memref.load %arg1[%c59] : memref<113xf32, #tpu.memory_space<smem>>
    %c60 = arith.constant 60 : index
    %60 = memref.load %arg1[%c60] : memref<113xf32, #tpu.memory_space<smem>>
    %c61 = arith.constant 61 : index
    %61 = memref.load %arg1[%c61] : memref<113xf32, #tpu.memory_space<smem>>
    %c62 = arith.constant 62 : index
    %62 = memref.load %arg1[%c62] : memref<113xf32, #tpu.memory_space<smem>>
    %c63 = arith.constant 63 : index
    %63 = memref.load %arg1[%c63] : memref<113xf32, #tpu.memory_space<smem>>
    %c64 = arith.constant 64 : index
    %64 = memref.load %arg1[%c64] : memref<113xf32, #tpu.memory_space<smem>>
    %c65 = arith.constant 65 : index
    %65 = memref.load %arg1[%c65] : memref<113xf32, #tpu.memory_space<smem>>
    %c66 = arith.constant 66 : index
    %66 = memref.load %arg1[%c66] : memref<113xf32, #tpu.memory_space<smem>>
    %c67 = arith.constant 67 : index
    %67 = memref.load %arg1[%c67] : memref<113xf32, #tpu.memory_space<smem>>
    %c68 = arith.constant 68 : index
    %68 = memref.load %arg1[%c68] : memref<113xf32, #tpu.memory_space<smem>>
    %c69 = arith.constant 69 : index
    %69 = memref.load %arg1[%c69] : memref<113xf32, #tpu.memory_space<smem>>
    %c70 = arith.constant 70 : index
    %70 = memref.load %arg1[%c70] : memref<113xf32, #tpu.memory_space<smem>>
    %c71 = arith.constant 71 : index
    %71 = memref.load %arg1[%c71] : memref<113xf32, #tpu.memory_space<smem>>
    %c72 = arith.constant 72 : index
    %72 = memref.load %arg1[%c72] : memref<113xf32, #tpu.memory_space<smem>>
    %c73 = arith.constant 73 : index
    %73 = memref.load %arg1[%c73] : memref<113xf32, #tpu.memory_space<smem>>
    %c74 = arith.constant 74 : index
    %74 = memref.load %arg1[%c74] : memref<113xf32, #tpu.memory_space<smem>>
    %c75 = arith.constant 75 : index
    %75 = memref.load %arg1[%c75] : memref<113xf32, #tpu.memory_space<smem>>
    %c76 = arith.constant 76 : index
    %76 = memref.load %arg1[%c76] : memref<113xf32, #tpu.memory_space<smem>>
    %c77 = arith.constant 77 : index
    %77 = memref.load %arg1[%c77] : memref<113xf32, #tpu.memory_space<smem>>
    %c78 = arith.constant 78 : index
    %78 = memref.load %arg1[%c78] : memref<113xf32, #tpu.memory_space<smem>>
    %c79 = arith.constant 79 : index
    %79 = memref.load %arg1[%c79] : memref<113xf32, #tpu.memory_space<smem>>
    %c80 = arith.constant 80 : index
    %80 = memref.load %arg1[%c80] : memref<113xf32, #tpu.memory_space<smem>>
    %c81 = arith.constant 81 : index
    %81 = memref.load %arg1[%c81] : memref<113xf32, #tpu.memory_space<smem>>
    %c82 = arith.constant 82 : index
    %82 = memref.load %arg1[%c82] : memref<113xf32, #tpu.memory_space<smem>>
    %c83 = arith.constant 83 : index
    %83 = memref.load %arg1[%c83] : memref<113xf32, #tpu.memory_space<smem>>
    %c84 = arith.constant 84 : index
    %84 = memref.load %arg1[%c84] : memref<113xf32, #tpu.memory_space<smem>>
    %c85 = arith.constant 85 : index
    %85 = memref.load %arg1[%c85] : memref<113xf32, #tpu.memory_space<smem>>
    %c86 = arith.constant 86 : index
    %86 = memref.load %arg1[%c86] : memref<113xf32, #tpu.memory_space<smem>>
    %c87 = arith.constant 87 : index
    %87 = memref.load %arg1[%c87] : memref<113xf32, #tpu.memory_space<smem>>
    %c88 = arith.constant 88 : index
    %88 = memref.load %arg1[%c88] : memref<113xf32, #tpu.memory_space<smem>>
    %c89 = arith.constant 89 : index
    %89 = memref.load %arg1[%c89] : memref<113xf32, #tpu.memory_space<smem>>
    %c90 = arith.constant 90 : index
    %90 = memref.load %arg1[%c90] : memref<113xf32, #tpu.memory_space<smem>>
    %c91 = arith.constant 91 : index
    %91 = memref.load %arg1[%c91] : memref<113xf32, #tpu.memory_space<smem>>
    %c92 = arith.constant 92 : index
    %92 = memref.load %arg1[%c92] : memref<113xf32, #tpu.memory_space<smem>>
    %c93 = arith.constant 93 : index
    %93 = memref.load %arg1[%c93] : memref<113xf32, #tpu.memory_space<smem>>
    %c94 = arith.constant 94 : index
    %94 = memref.load %arg1[%c94] : memref<113xf32, #tpu.memory_space<smem>>
    %c95 = arith.constant 95 : index
    %95 = memref.load %arg1[%c95] : memref<113xf32, #tpu.memory_space<smem>>
    %c96 = arith.constant 96 : index
    %96 = memref.load %arg1[%c96] : memref<113xf32, #tpu.memory_space<smem>>
    %c97 = arith.constant 97 : index
    %97 = memref.load %arg1[%c97] : memref<113xf32, #tpu.memory_space<smem>>
    %c98 = arith.constant 98 : index
    %98 = memref.load %arg1[%c98] : memref<113xf32, #tpu.memory_space<smem>>
    %c99 = arith.constant 99 : index
    %99 = memref.load %arg1[%c99] : memref<113xf32, #tpu.memory_space<smem>>
    %c100 = arith.constant 100 : index
    %100 = memref.load %arg1[%c100] : memref<113xf32, #tpu.memory_space<smem>>
    %c101 = arith.constant 101 : index
    %101 = memref.load %arg1[%c101] : memref<113xf32, #tpu.memory_space<smem>>
    %c102 = arith.constant 102 : index
    %102 = memref.load %arg1[%c102] : memref<113xf32, #tpu.memory_space<smem>>
    %c103 = arith.constant 103 : index
    %103 = memref.load %arg1[%c103] : memref<113xf32, #tpu.memory_space<smem>>
    %c104 = arith.constant 104 : index
    %104 = memref.load %arg1[%c104] : memref<113xf32, #tpu.memory_space<smem>>
    %c105 = arith.constant 105 : index
    %105 = memref.load %arg1[%c105] : memref<113xf32, #tpu.memory_space<smem>>
    %c106 = arith.constant 106 : index
    %106 = memref.load %arg1[%c106] : memref<113xf32, #tpu.memory_space<smem>>
    %c107 = arith.constant 107 : index
    %107 = memref.load %arg1[%c107] : memref<113xf32, #tpu.memory_space<smem>>
    %c108 = arith.constant 108 : index
    %108 = memref.load %arg1[%c108] : memref<113xf32, #tpu.memory_space<smem>>
    %c109 = arith.constant 109 : index
    %109 = memref.load %arg1[%c109] : memref<113xf32, #tpu.memory_space<smem>>
    %c110 = arith.constant 110 : index
    %110 = memref.load %arg1[%c110] : memref<113xf32, #tpu.memory_space<smem>>
    %c111 = arith.constant 111 : index
    %111 = memref.load %arg1[%c111] : memref<113xf32, #tpu.memory_space<smem>>
    %c112 = arith.constant 112 : index
    %112 = memref.load %arg1[%c112] : memref<113xf32, #tpu.memory_space<smem>>
    %c0_i32 = arith.constant 0 : i32
    %c4_i32 = arith.constant 4 : i32
    %113 = arith.addi %c0_i32, %c4_i32 : i32
    %c1_i32 = arith.constant 1 : i32
    scf.for %arg8 = %c0_i32 to %113 step %c1_i32  : i32 {
      %c1_i32_11 = arith.constant 1 : i32
      %127 = arith.muli %arg8, %c1_i32_11 : i32
      %c0_i32_12 = arith.constant 0 : i32
      %128 = arith.addi %c0_i32_12, %127 : i32
      %c8_i32 = arith.constant 8 : i32
      %129 = arith.muli %128, %c8_i32 : i32
      %130 = tpu.assume_multiple %129, 8 : i32
      %131 = arith.index_cast %130 : i32 to index
      %c0_13 = arith.constant 0 : index
      %132 = vector.load %arg2[%131, %c0_13] : memref<32x128xf32, #tpu.memory_space<vmem>>, vector<8x128xf32>
      %133 = vector.broadcast %0 : f32 to vector<8x128xf32>
      %134 = arith.mulf %133, %132 : vector<8x128xf32>
      %135 = vector.broadcast %8 : f32 to vector<8x128xf32>
      %136 = arith.addf %134, %135 : vector<8x128xf32>
      %cst_14 = arith.constant 0.000000e+00 : f32
      %137 = vector.broadcast %cst_14 : f32 to vector<8x128xf32>
      %138 = arith.maximumf %136, %137 : vector<8x128xf32>
      %139 = vector.broadcast %1 : f32 to vector<8x128xf32>
      %140 = arith.mulf %139, %132 : vector<8x128xf32>
      %141 = vector.broadcast %9 : f32 to vector<8x128xf32>
      %142 = arith.addf %140, %141 : vector<8x128xf32>
      %cst_15 = arith.constant 0.000000e+00 : f32
      %143 = vector.broadcast %cst_15 : f32 to vector<8x128xf32>
      %144 = arith.maximumf %142, %143 : vector<8x128xf32>
      %145 = vector.broadcast %2 : f32 to vector<8x128xf32>
      %146 = arith.mulf %145, %132 : vector<8x128xf32>
      %147 = vector.broadcast %10 : f32 to vector<8x128xf32>
      %148 = arith.addf %146, %147 : vector<8x128xf32>
      %cst_16 = arith.constant 0.000000e+00 : f32
      %149 = vector.broadcast %cst_16 : f32 to vector<8x128xf32>
      %150 = arith.maximumf %148, %149 : vector<8x128xf32>
      %151 = vector.broadcast %3 : f32 to vector<8x128xf32>
      %152 = arith.mulf %151, %132 : vector<8x128xf32>
      %153 = vector.broadcast %11 : f32 to vector<8x128xf32>
      %154 = arith.addf %152, %153 : vector<8x128xf32>
      %cst_17 = arith.constant 0.000000e+00 : f32
      %155 = vector.broadcast %cst_17 : f32 to vector<8x128xf32>
      %156 = arith.maximumf %154, %155 : vector<8x128xf32>
      %157 = vector.broadcast %4 : f32 to vector<8x128xf32>
      %158 = arith.mulf %157, %132 : vector<8x128xf32>
      %159 = vector.broadcast %12 : f32 to vector<8x128xf32>
      %160 = arith.addf %158, %159 : vector<8x128xf32>
      %cst_18 = arith.constant 0.000000e+00 : f32
      %161 = vector.broadcast %cst_18 : f32 to vector<8x128xf32>
      %162 = arith.maximumf %160, %161 : vector<8x128xf32>
      %163 = vector.broadcast %5 : f32 to vector<8x128xf32>
      %164 = arith.mulf %163, %132 : vector<8x128xf32>
      %165 = vector.broadcast %13 : f32 to vector<8x128xf32>
      %166 = arith.addf %164, %165 : vector<8x128xf32>
      %cst_19 = arith.constant 0.000000e+00 : f32
      %167 = vector.broadcast %cst_19 : f32 to vector<8x128xf32>
      %168 = arith.maximumf %166, %167 : vector<8x128xf32>
      %169 = vector.broadcast %6 : f32 to vector<8x128xf32>
      %170 = arith.mulf %169, %132 : vector<8x128xf32>
      %171 = vector.broadcast %14 : f32 to vector<8x128xf32>
      %172 = arith.addf %170, %171 : vector<8x128xf32>
      %cst_20 = arith.constant 0.000000e+00 : f32
      %173 = vector.broadcast %cst_20 : f32 to vector<8x128xf32>
      %174 = arith.maximumf %172, %173 : vector<8x128xf32>
      %175 = vector.broadcast %7 : f32 to vector<8x128xf32>
      %176 = arith.mulf %175, %132 : vector<8x128xf32>
      %177 = vector.broadcast %15 : f32 to vector<8x128xf32>
      %178 = arith.addf %176, %177 : vector<8x128xf32>
      %cst_21 = arith.constant 0.000000e+00 : f32
      %179 = vector.broadcast %cst_21 : f32 to vector<8x128xf32>
      %180 = arith.maximumf %178, %179 : vector<8x128xf32>
      %181 = vector.broadcast %16 : f32 to vector<8x128xf32>
      %182 = arith.mulf %181, %132 : vector<8x128xf32>
      %183 = vector.broadcast %24 : f32 to vector<8x128xf32>
      %184 = arith.addf %182, %183 : vector<8x128xf32>
      %cst_22 = arith.constant 0.000000e+00 : f32
      %185 = vector.broadcast %cst_22 : f32 to vector<8x128xf32>
      %186 = arith.maximumf %184, %185 : vector<8x128xf32>
      %187 = vector.broadcast %17 : f32 to vector<8x128xf32>
      %188 = arith.mulf %187, %132 : vector<8x128xf32>
      %189 = vector.broadcast %25 : f32 to vector<8x128xf32>
      %190 = arith.addf %188, %189 : vector<8x128xf32>
      %cst_23 = arith.constant 0.000000e+00 : f32
      %191 = vector.broadcast %cst_23 : f32 to vector<8x128xf32>
      %192 = arith.maximumf %190, %191 : vector<8x128xf32>
      %193 = vector.broadcast %18 : f32 to vector<8x128xf32>
      %194 = arith.mulf %193, %132 : vector<8x128xf32>
      %195 = vector.broadcast %26 : f32 to vector<8x128xf32>
      %196 = arith.addf %194, %195 : vector<8x128xf32>
      %cst_24 = arith.constant 0.000000e+00 : f32
      %197 = vector.broadcast %cst_24 : f32 to vector<8x128xf32>
      %198 = arith.maximumf %196, %197 : vector<8x128xf32>
      %199 = vector.broadcast %19 : f32 to vector<8x128xf32>
      %200 = arith.mulf %199, %132 : vector<8x128xf32>
      %201 = vector.broadcast %27 : f32 to vector<8x128xf32>
      %202 = arith.addf %200, %201 : vector<8x128xf32>
      %cst_25 = arith.constant 0.000000e+00 : f32
      %203 = vector.broadcast %cst_25 : f32 to vector<8x128xf32>
      %204 = arith.maximumf %202, %203 : vector<8x128xf32>
      %205 = vector.broadcast %20 : f32 to vector<8x128xf32>
      %206 = arith.mulf %205, %132 : vector<8x128xf32>
      %207 = vector.broadcast %28 : f32 to vector<8x128xf32>
      %208 = arith.addf %206, %207 : vector<8x128xf32>
      %cst_26 = arith.constant 0.000000e+00 : f32
      %209 = vector.broadcast %cst_26 : f32 to vector<8x128xf32>
      %210 = arith.maximumf %208, %209 : vector<8x128xf32>
      %211 = vector.broadcast %21 : f32 to vector<8x128xf32>
      %212 = arith.mulf %211, %132 : vector<8x128xf32>
      %213 = vector.broadcast %29 : f32 to vector<8x128xf32>
      %214 = arith.addf %212, %213 : vector<8x128xf32>
      %cst_27 = arith.constant 0.000000e+00 : f32
      %215 = vector.broadcast %cst_27 : f32 to vector<8x128xf32>
      %216 = arith.maximumf %214, %215 : vector<8x128xf32>
      %217 = vector.broadcast %22 : f32 to vector<8x128xf32>
      %218 = arith.mulf %217, %132 : vector<8x128xf32>
      %219 = vector.broadcast %30 : f32 to vector<8x128xf32>
      %220 = arith.addf %218, %219 : vector<8x128xf32>
      %cst_28 = arith.constant 0.000000e+00 : f32
      %221 = vector.broadcast %cst_28 : f32 to vector<8x128xf32>
      %222 = arith.maximumf %220, %221 : vector<8x128xf32>
      %223 = vector.broadcast %23 : f32 to vector<8x128xf32>
      %224 = arith.mulf %223, %132 : vector<8x128xf32>
      %225 = vector.broadcast %31 : f32 to vector<8x128xf32>
      %226 = arith.addf %224, %225 : vector<8x128xf32>
      %cst_29 = arith.constant 0.000000e+00 : f32
      %227 = vector.broadcast %cst_29 : f32 to vector<8x128xf32>
      %228 = arith.maximumf %226, %227 : vector<8x128xf32>
      %229 = vector.broadcast %104 : f32 to vector<8x128xf32>
      %230 = arith.mulf %229, %186 : vector<8x128xf32>
      %231 = vector.broadcast %105 : f32 to vector<8x128xf32>
      %232 = arith.mulf %231, %192 : vector<8x128xf32>
      %233 = arith.addf %230, %232 : vector<8x128xf32>
      %234 = vector.broadcast %106 : f32 to vector<8x128xf32>
      %235 = arith.mulf %234, %198 : vector<8x128xf32>
      %236 = arith.addf %233, %235 : vector<8x128xf32>
      %237 = vector.broadcast %107 : f32 to vector<8x128xf32>
      %238 = arith.mulf %237, %204 : vector<8x128xf32>
      %239 = arith.addf %236, %238 : vector<8x128xf32>
      %240 = vector.broadcast %108 : f32 to vector<8x128xf32>
      %241 = arith.mulf %240, %210 : vector<8x128xf32>
      %242 = arith.addf %239, %241 : vector<8x128xf32>
      %243 = vector.broadcast %109 : f32 to vector<8x128xf32>
      %244 = arith.mulf %243, %216 : vector<8x128xf32>
      %245 = arith.addf %242, %244 : vector<8x128xf32>
      %246 = vector.broadcast %110 : f32 to vector<8x128xf32>
      %247 = arith.mulf %246, %222 : vector<8x128xf32>
      %248 = arith.addf %245, %247 : vector<8x128xf32>
      %249 = vector.broadcast %111 : f32 to vector<8x128xf32>
      %250 = arith.mulf %249, %228 : vector<8x128xf32>
      %251 = arith.addf %248, %250 : vector<8x128xf32>
      %252 = vector.broadcast %32 : f32 to vector<8x128xf32>
      %253 = arith.mulf %252, %186 : vector<8x128xf32>
      %254 = vector.broadcast %33 : f32 to vector<8x128xf32>
      %255 = arith.mulf %254, %192 : vector<8x128xf32>
      %256 = arith.addf %253, %255 : vector<8x128xf32>
      %257 = vector.broadcast %34 : f32 to vector<8x128xf32>
      %258 = arith.mulf %257, %198 : vector<8x128xf32>
      %259 = arith.addf %256, %258 : vector<8x128xf32>
      %260 = vector.broadcast %35 : f32 to vector<8x128xf32>
      %261 = arith.mulf %260, %204 : vector<8x128xf32>
      %262 = arith.addf %259, %261 : vector<8x128xf32>
      %263 = vector.broadcast %36 : f32 to vector<8x128xf32>
      %264 = arith.mulf %263, %210 : vector<8x128xf32>
      %265 = arith.addf %262, %264 : vector<8x128xf32>
      %266 = vector.broadcast %37 : f32 to vector<8x128xf32>
      %267 = arith.mulf %266, %216 : vector<8x128xf32>
      %268 = arith.addf %265, %267 : vector<8x128xf32>
      %269 = vector.broadcast %38 : f32 to vector<8x128xf32>
      %270 = arith.mulf %269, %222 : vector<8x128xf32>
      %271 = arith.addf %268, %270 : vector<8x128xf32>
      %272 = vector.broadcast %39 : f32 to vector<8x128xf32>
      %273 = arith.mulf %272, %228 : vector<8x128xf32>
      %274 = arith.addf %271, %273 : vector<8x128xf32>
      %275 = vector.broadcast %96 : f32 to vector<8x128xf32>
      %276 = arith.addf %274, %275 : vector<8x128xf32>
      %277 = arith.mulf %138, %276 : vector<8x128xf32>
      %278 = arith.addf %251, %277 : vector<8x128xf32>
      %279 = vector.broadcast %40 : f32 to vector<8x128xf32>
      %280 = arith.mulf %279, %186 : vector<8x128xf32>
      %281 = vector.broadcast %41 : f32 to vector<8x128xf32>
      %282 = arith.mulf %281, %192 : vector<8x128xf32>
      %283 = arith.addf %280, %282 : vector<8x128xf32>
      %284 = vector.broadcast %42 : f32 to vector<8x128xf32>
      %285 = arith.mulf %284, %198 : vector<8x128xf32>
      %286 = arith.addf %283, %285 : vector<8x128xf32>
      %287 = vector.broadcast %43 : f32 to vector<8x128xf32>
      %288 = arith.mulf %287, %204 : vector<8x128xf32>
      %289 = arith.addf %286, %288 : vector<8x128xf32>
      %290 = vector.broadcast %44 : f32 to vector<8x128xf32>
      %291 = arith.mulf %290, %210 : vector<8x128xf32>
      %292 = arith.addf %289, %291 : vector<8x128xf32>
      %293 = vector.broadcast %45 : f32 to vector<8x128xf32>
      %294 = arith.mulf %293, %216 : vector<8x128xf32>
      %295 = arith.addf %292, %294 : vector<8x128xf32>
      %296 = vector.broadcast %46 : f32 to vector<8x128xf32>
      %297 = arith.mulf %296, %222 : vector<8x128xf32>
      %298 = arith.addf %295, %297 : vector<8x128xf32>
      %299 = vector.broadcast %47 : f32 to vector<8x128xf32>
      %300 = arith.mulf %299, %228 : vector<8x128xf32>
      %301 = arith.addf %298, %300 : vector<8x128xf32>
      %302 = vector.broadcast %97 : f32 to vector<8x128xf32>
      %303 = arith.addf %301, %302 : vector<8x128xf32>
      %304 = arith.mulf %144, %303 : vector<8x128xf32>
      %305 = arith.addf %278, %304 : vector<8x128xf32>
      %306 = vector.broadcast %48 : f32 to vector<8x128xf32>
      %307 = arith.mulf %306, %186 : vector<8x128xf32>
      %308 = vector.broadcast %49 : f32 to vector<8x128xf32>
      %309 = arith.mulf %308, %192 : vector<8x128xf32>
      %310 = arith.addf %307, %309 : vector<8x128xf32>
      %311 = vector.broadcast %50 : f32 to vector<8x128xf32>
      %312 = arith.mulf %311, %198 : vector<8x128xf32>
      %313 = arith.addf %310, %312 : vector<8x128xf32>
      %314 = vector.broadcast %51 : f32 to vector<8x128xf32>
      %315 = arith.mulf %314, %204 : vector<8x128xf32>
      %316 = arith.addf %313, %315 : vector<8x128xf32>
      %317 = vector.broadcast %52 : f32 to vector<8x128xf32>
      %318 = arith.mulf %317, %210 : vector<8x128xf32>
      %319 = arith.addf %316, %318 : vector<8x128xf32>
      %320 = vector.broadcast %53 : f32 to vector<8x128xf32>
      %321 = arith.mulf %320, %216 : vector<8x128xf32>
      %322 = arith.addf %319, %321 : vector<8x128xf32>
      %323 = vector.broadcast %54 : f32 to vector<8x128xf32>
      %324 = arith.mulf %323, %222 : vector<8x128xf32>
      %325 = arith.addf %322, %324 : vector<8x128xf32>
      %326 = vector.broadcast %55 : f32 to vector<8x128xf32>
      %327 = arith.mulf %326, %228 : vector<8x128xf32>
      %328 = arith.addf %325, %327 : vector<8x128xf32>
      %329 = vector.broadcast %98 : f32 to vector<8x128xf32>
      %330 = arith.addf %328, %329 : vector<8x128xf32>
      %331 = arith.mulf %150, %330 : vector<8x128xf32>
      %332 = arith.addf %305, %331 : vector<8x128xf32>
      %333 = vector.broadcast %56 : f32 to vector<8x128xf32>
      %334 = arith.mulf %333, %186 : vector<8x128xf32>
      %335 = vector.broadcast %57 : f32 to vector<8x128xf32>
      %336 = arith.mulf %335, %192 : vector<8x128xf32>
      %337 = arith.addf %334, %336 : vector<8x128xf32>
      %338 = vector.broadcast %58 : f32 to vector<8x128xf32>
      %339 = arith.mulf %338, %198 : vector<8x128xf32>
      %340 = arith.addf %337, %339 : vector<8x128xf32>
      %341 = vector.broadcast %59 : f32 to vector<8x128xf32>
      %342 = arith.mulf %341, %204 : vector<8x128xf32>
      %343 = arith.addf %340, %342 : vector<8x128xf32>
      %344 = vector.broadcast %60 : f32 to vector<8x128xf32>
      %345 = arith.mulf %344, %210 : vector<8x128xf32>
      %346 = arith.addf %343, %345 : vector<8x128xf32>
      %347 = vector.broadcast %61 : f32 to vector<8x128xf32>
      %348 = arith.mulf %347, %216 : vector<8x128xf32>
      %349 = arith.addf %346, %348 : vector<8x128xf32>
      %350 = vector.broadcast %62 : f32 to vector<8x128xf32>
      %351 = arith.mulf %350, %222 : vector<8x128xf32>
      %352 = arith.addf %349, %351 : vector<8x128xf32>
      %353 = vector.broadcast %63 : f32 to vector<8x128xf32>
      %354 = arith.mulf %353, %228 : vector<8x128xf32>
      %355 = arith.addf %352, %354 : vector<8x128xf32>
      %356 = vector.broadcast %99 : f32 to vector<8x128xf32>
      %357 = arith.addf %355, %356 : vector<8x128xf32>
      %358 = arith.mulf %156, %357 : vector<8x128xf32>
      %359 = arith.addf %332, %358 : vector<8x128xf32>
      %360 = vector.broadcast %64 : f32 to vector<8x128xf32>
      %361 = arith.mulf %360, %186 : vector<8x128xf32>
      %362 = vector.broadcast %65 : f32 to vector<8x128xf32>
      %363 = arith.mulf %362, %192 : vector<8x128xf32>
      %364 = arith.addf %361, %363 : vector<8x128xf32>
      %365 = vector.broadcast %66 : f32 to vector<8x128xf32>
      %366 = arith.mulf %365, %198 : vector<8x128xf32>
      %367 = arith.addf %364, %366 : vector<8x128xf32>
      %368 = vector.broadcast %67 : f32 to vector<8x128xf32>
      %369 = arith.mulf %368, %204 : vector<8x128xf32>
      %370 = arith.addf %367, %369 : vector<8x128xf32>
      %371 = vector.broadcast %68 : f32 to vector<8x128xf32>
      %372 = arith.mulf %371, %210 : vector<8x128xf32>
      %373 = arith.addf %370, %372 : vector<8x128xf32>
      %374 = vector.broadcast %69 : f32 to vector<8x128xf32>
      %375 = arith.mulf %374, %216 : vector<8x128xf32>
      %376 = arith.addf %373, %375 : vector<8x128xf32>
      %377 = vector.broadcast %70 : f32 to vector<8x128xf32>
      %378 = arith.mulf %377, %222 : vector<8x128xf32>
      %379 = arith.addf %376, %378 : vector<8x128xf32>
      %380 = vector.broadcast %71 : f32 to vector<8x128xf32>
      %381 = arith.mulf %380, %228 : vector<8x128xf32>
      %382 = arith.addf %379, %381 : vector<8x128xf32>
      %383 = vector.broadcast %100 : f32 to vector<8x128xf32>
      %384 = arith.addf %382, %383 : vector<8x128xf32>
      %385 = arith.mulf %162, %384 : vector<8x128xf32>
      %386 = arith.addf %359, %385 : vector<8x128xf32>
      %387 = vector.broadcast %72 : f32 to vector<8x128xf32>
      %388 = arith.mulf %387, %186 : vector<8x128xf32>
      %389 = vector.broadcast %73 : f32 to vector<8x128xf32>
      %390 = arith.mulf %389, %192 : vector<8x128xf32>
      %391 = arith.addf %388, %390 : vector<8x128xf32>
      %392 = vector.broadcast %74 : f32 to vector<8x128xf32>
      %393 = arith.mulf %392, %198 : vector<8x128xf32>
      %394 = arith.addf %391, %393 : vector<8x128xf32>
      %395 = vector.broadcast %75 : f32 to vector<8x128xf32>
      %396 = arith.mulf %395, %204 : vector<8x128xf32>
      %397 = arith.addf %394, %396 : vector<8x128xf32>
      %398 = vector.broadcast %76 : f32 to vector<8x128xf32>
      %399 = arith.mulf %398, %210 : vector<8x128xf32>
      %400 = arith.addf %397, %399 : vector<8x128xf32>
      %401 = vector.broadcast %77 : f32 to vector<8x128xf32>
      %402 = arith.mulf %401, %216 : vector<8x128xf32>
      %403 = arith.addf %400, %402 : vector<8x128xf32>
      %404 = vector.broadcast %78 : f32 to vector<8x128xf32>
      %405 = arith.mulf %404, %222 : vector<8x128xf32>
      %406 = arith.addf %403, %405 : vector<8x128xf32>
      %407 = vector.broadcast %79 : f32 to vector<8x128xf32>
      %408 = arith.mulf %407, %228 : vector<8x128xf32>
      %409 = arith.addf %406, %408 : vector<8x128xf32>
      %410 = vector.broadcast %101 : f32 to vector<8x128xf32>
      %411 = arith.addf %409, %410 : vector<8x128xf32>
      %412 = arith.mulf %168, %411 : vector<8x128xf32>
      %413 = arith.addf %386, %412 : vector<8x128xf32>
      %414 = vector.broadcast %80 : f32 to vector<8x128xf32>
      %415 = arith.mulf %414, %186 : vector<8x128xf32>
      %416 = vector.broadcast %81 : f32 to vector<8x128xf32>
      %417 = arith.mulf %416, %192 : vector<8x128xf32>
      %418 = arith.addf %415, %417 : vector<8x128xf32>
      %419 = vector.broadcast %82 : f32 to vector<8x128xf32>
      %420 = arith.mulf %419, %198 : vector<8x128xf32>
      %421 = arith.addf %418, %420 : vector<8x128xf32>
      %422 = vector.broadcast %83 : f32 to vector<8x128xf32>
      %423 = arith.mulf %422, %204 : vector<8x128xf32>
      %424 = arith.addf %421, %423 : vector<8x128xf32>
      %425 = vector.broadcast %84 : f32 to vector<8x128xf32>
      %426 = arith.mulf %425, %210 : vector<8x128xf32>
      %427 = arith.addf %424, %426 : vector<8x128xf32>
      %428 = vector.broadcast %85 : f32 to vector<8x128xf32>
      %429 = arith.mulf %428, %216 : vector<8x128xf32>
      %430 = arith.addf %427, %429 : vector<8x128xf32>
      %431 = vector.broadcast %86 : f32 to vector<8x128xf32>
      %432 = arith.mulf %431, %222 : vector<8x128xf32>
      %433 = arith.addf %430, %432 : vector<8x128xf32>
      %434 = vector.broadcast %87 : f32 to vector<8x128xf32>
      %435 = arith.mulf %434, %228 : vector<8x128xf32>
      %436 = arith.addf %433, %435 : vector<8x128xf32>
      %437 = vector.broadcast %102 : f32 to vector<8x128xf32>
      %438 = arith.addf %436, %437 : vector<8x128xf32>
      %439 = arith.mulf %174, %438 : vector<8x128xf32>
      %440 = arith.addf %413, %439 : vector<8x128xf32>
      %441 = vector.broadcast %88 : f32 to vector<8x128xf32>
      %442 = arith.mulf %441, %186 : vector<8x128xf32>
      %443 = vector.broadcast %89 : f32 to vector<8x128xf32>
      %444 = arith.mulf %443, %192 : vector<8x128xf32>
      %445 = arith.addf %442, %444 : vector<8x128xf32>
      %446 = vector.broadcast %90 : f32 to vector<8x128xf32>
      %447 = arith.mulf %446, %198 : vector<8x128xf32>
      %448 = arith.addf %445, %447 : vector<8x128xf32>
      %449 = vector.broadcast %91 : f32 to vector<8x128xf32>
      %450 = arith.mulf %449, %204 : vector<8x128xf32>
      %451 = arith.addf %448, %450 : vector<8x128xf32>
      %452 = vector.broadcast %92 : f32 to vector<8x128xf32>
      %453 = arith.mulf %452, %210 : vector<8x128xf32>
      %454 = arith.addf %451, %453 : vector<8x128xf32>
      %455 = vector.broadcast %93 : f32 to vector<8x128xf32>
      %456 = arith.mulf %455, %216 : vector<8x128xf32>
      %457 = arith.addf %454, %456 : vector<8x128xf32>
      %458 = vector.broadcast %94 : f32 to vector<8x128xf32>
      %459 = arith.mulf %458, %222 : vector<8x128xf32>
      %460 = arith.addf %457, %459 : vector<8x128xf32>
      %461 = vector.broadcast %95 : f32 to vector<8x128xf32>
      %462 = arith.mulf %461, %228 : vector<8x128xf32>
      %463 = arith.addf %460, %462 : vector<8x128xf32>
      %464 = vector.broadcast %103 : f32 to vector<8x128xf32>
      %465 = arith.addf %463, %464 : vector<8x128xf32>
      %466 = arith.mulf %180, %465 : vector<8x128xf32>
      %467 = arith.addf %440, %466 : vector<8x128xf32>
      %468 = vector.broadcast %112 : f32 to vector<8x128xf32>
      %469 = arith.addf %467, %468 : vector<8x128xf32>
      %cst_30 = arith.constant 0.000000e+00 : f32
      %470 = vector.broadcast %cst_30 : f32 to vector<8x128xf32>
      %471 = arith.subf %470, %469 : vector<8x128xf32>
      %472 = math.exp %471 : vector<8x128xf32>
      %cst_31 = arith.constant 1.000000e+00 : f32
      %473 = vector.broadcast %cst_31 : f32 to vector<8x128xf32>
      %474 = arith.addf %472, %473 : vector<8x128xf32>
      %475 = tpu.reciprocal %474 : vector<8x128xf32> -> vector<8x128xf32>
      %476 = arith.index_cast %130 : i32 to index
      %c0_32 = arith.constant 0 : index
      %477 = vector.load %arg5[%476, %c0_32] : memref<32x128xf32, #tpu.memory_space<vmem>>, vector<8x128xf32>
      tpu.vector_store %arg5[%476, %c0_32], %475 {strides = array<i32>} : memref<32x128xf32, #tpu.memory_space<vmem>>, vector<8x128xf32>,
      %478 = arith.mulf %475, %132 : vector<8x128xf32>
      %479 = arith.index_cast %130 : i32 to index
      %c0_33 = arith.constant 0 : index
      %480 = vector.load %arg7[%479, %c0_33] : memref<32x128xf32, #tpu.memory_space<vmem>>, vector<8x128xf32>
      tpu.vector_store %arg7[%479, %c0_33], %478 {strides = array<i32>} : memref<32x128xf32, #tpu.memory_space<vmem>>, vector<8x128xf32>,
    }
    %c4_i32_0 = arith.constant 4 : i32
    %c0_1 = arith.constant 0 : index
    %c0_2 = arith.constant 0 : index
    %114 = vector.load %arg7[%c0_1, %c0_2] : memref<32x128xf32, #tpu.memory_space<vmem>>, vector<32x128xf32>
    %c0_3 = arith.constant 0 : index
    %c0_4 = arith.constant 0 : index
    %115 = vector.load %arg3[%c0_3, %c0_4] : memref<128x128xf32, #tpu.memory_space<vmem>>, vector<128x128xf32>
    %cst = arith.constant dense<0.000000e+00> : vector<32x128xf32>
    %116 = tpu.matmul %114, %115, %cst {dimension_numbers = #tpu.dot_dimension_numbers<[1], [0], [0], [1], [0, 0, 1, 1], [], []>, precision = #tpu.contract_precision<fp32>} : vector<32x128xf32>, vector<128x128xf32>, vector<32x128xf32> -> vector<32x128xf32>
    %c0_5 = arith.constant 0 : index
    %c0_6 = arith.constant 0 : index
    %117 = vector.load %arg4[%c0_5, %c0_6] : memref<1x128xf32, #tpu.memory_space<vmem>>, vector<1x128xf32>
    %118 = vector.broadcast %117 : vector<1x128xf32> to vector<32x128xf32>
    %119 = arith.addf %116, %118 : vector<32x128xf32>
    %cst_7 = arith.constant 0.000000e+00 : f32
    %120 = vector.broadcast %cst_7 : f32 to vector<32x128xf32>
    %121 = arith.subf %120, %119 : vector<32x128xf32>
    %122 = math.exp %121 : vector<32x128xf32>
    %cst_8 = arith.constant 1.000000e+00 : f32
    %123 = vector.broadcast %cst_8 : f32 to vector<32x128xf32>
    %124 = arith.addf %122, %123 : vector<32x128xf32>
    %125 = tpu.reciprocal %124 : vector<32x128xf32> -> vector<32x128xf32>
    %c0_9 = arith.constant 0 : index
    %c0_10 = arith.constant 0 : index
    %126 = vector.load %arg6[%c0_9, %c0_10] : memref<32x128xf32, #tpu.memory_space<vmem>>, vector<32x128xf32>
    tpu.vector_store %arg6[%c0_9, %c0_10], %125 {strides = array<i32>} : memref<32x128xf32, #tpu.memory_space<vmem>>, vector<32x128xf32>,
    return
  }
  func.func @transform_0(%arg0: i32) -> i32 {
    %c0_i32 = arith.constant 0 : i32
    %c0_i32_0 = arith.constant 0 : i32
    return %c0_i32 : i32
  }
  func.func @transform_1(%arg0: i32) -> (i32, i32) {
    %c0_i32 = arith.constant 0 : i32
    %c0_i32_0 = arith.constant 0 : i32
    return %arg0, %c0_i32 : i32, i32
  }
  func.func @transform_2(%arg0: i32) -> (i32, i32) {
    %c0_i32 = arith.constant 0 : i32
    %c0_i32_0 = arith.constant 0 : i32
    %c0_i32_1 = arith.constant 0 : i32
    return %c0_i32, %c0_i32_0 : i32, i32
  }
  func.func @transform_3(%arg0: i32) -> (i32, i32) {
    %c0_i32 = arith.constant 0 : i32
    %c0_i32_0 = arith.constant 0 : i32
    %c0_i32_1 = arith.constant 0 : i32
    return %c0_i32, %c0_i32_0 : i32, i32
  }
  func.func @transform_4(%arg0: i32) -> (i32, i32) {
    %c0_i32 = arith.constant 0 : i32
    %c0_i32_0 = arith.constant 0 : i32
    return %arg0, %c0_i32 : i32, i32
  }
  func.func @transform_5(%arg0: i32) -> (i32, i32) {
    %c0_i32 = arith.constant 0 : i32
    %c0_i32_0 = arith.constant 0 : i32
    return %arg0, %c0_i32 : i32, i32
  }
}

</mosaic_0001>

<bundles_post_ra>
// kernel: tabsra_forward.1
= control target key start
LH: loop header
LB: loop body
LE: loop exit
PB: predicated region body
PF: predicated region fallthrough
CT: control target
= control target key end

     0   :  { %s2081_s0 = inlined_call_operand.vmem [shape: f32[113], index: 0, kind: input, shape index: {}]   ;;  %s2082_s1 = inlined_call_operand.vmem [shape: f32[32,128], index: 1, kind: input, shape index: {}]   ;;  %s2083_s2 = inlined_call_operand.vmem [shape: f32[128,128], index: 2, kind: input, shape index: {}]   ;;  %s2084_s3 = inlined_call_operand.vmem [shape: f32[1,128], index: 3, kind: input, shape index: {}]   ;;  %s2085_s4 = inlined_call_operand.vmem [shape: f32[32,128], index: 4, kind: output, shape index: {0}]   ;;  %s2086_s5 = inlined_call_operand.vmem [shape: f32[32,128], index: 5, kind: output, shape index: {1}]  }
   0x1   :  { %2089 = sst [smem:[#allocation103_spill]] %s2082_s1 }
   0x2   :  { %2090 = sst [smem:[#allocation104_spill]] %s2083_s2 }
   0x3   :  { %2091 = sst [smem:[#allocation105_spill]] %s2084_s3 }
   0x4   :  { %2092 = sst [smem:[#allocation106_spill]] %s2085_s4 }
   0x5   :  { %2093 = sst [smem:[#allocation107_spill]] %s2086_s5 }
   0x6   :  { %11 = vsyncpa [#allocation4], 0  ;;  %s17_s20 = sshll.u32 %s2081_s0, 4  ;;  %s1249_s21 = smov [#allocation3]   ;;  %s18_s20 = int_to_ptr.vmem [resolvable:$true] %s17_s20 }
   0x7   :  { %20 = dma.vmem_to_smem %s18_s20, 16, %s1249_s21, [#allocation4]  }
   0x8   :  { %1243 = dma.done.wait [#allocation4], 16  }
   0x9   :  { %1244 = vsyncadd [#allocation4], 4294967280 }
   0xa   :  { %31 = sfence }
   0xb   :  { %s1283_s22 = sld [smem:[#allocation3]] }
   0xc   :  { %s1285_s23 = sld [smem:[#allocation3 + $0x1]] }
   0xd   :  { %s1287_s24 = sld [smem:[#allocation3 + $0x2]] }
   0xe   :  { %s1289_s25 = sld [smem:[#allocation3 + $0x3]] }
   0xf   :  { %s1291_s26 = sld [smem:[#allocation3 + $0x4]] }
  0x10   :  { %s1293_s27 = sld [smem:[#allocation3 + $0x5]] }
  0x11   :  { %2094 = sst [smem:[#allocation6_spill]] %s1283_s22 }
  0x12   :  { %2095 = sst [smem:[#allocation7_spill]] %s1285_s23 }
  0x13   :  { %s1295_s28 = sld [smem:[#allocation3 + $0x6]] }
  0x14   :  { %s1297_s0 = sld [smem:[#allocation3 + $0x7]] }
  0x15   :  { %s1299_s29 = sld [smem:[#allocation3 + $0x8]] }
  0x16   :  { %s1301_s30 = sld [smem:[#allocation3 + $0x9]] }
  0x17   :  { %s1303_s6 = sld [smem:[#allocation3 + $0xa]] }
  0x18   :  { %s1305_s7 = sld [smem:[#allocation3 + $0xb]] }
  0x19   :  { %s1307_s8 = sld [smem:[#allocation3 + $0xc]] }
  0x1a   :  { %s1309_s9 = sld [smem:[#allocation3 + $0xd]] }
  0x1b   :  { %s1311_s10 = sld [smem:[#allocation3 + $0xe]] }
  0x1c   :  { %s1313_s11 = sld [smem:[#allocation3 + $0xf]] }
  0x1d   :  { %2096 = sst [smem:[#allocation8_spill]] %s1303_s6 }
  0x1e   :  { %2097 = sst [smem:[#allocation9_spill]] %s1305_s7 }
  0x1f   :  { %s1315_s12 = sld [smem:[#allocation3 + $0x10]] }
  0x20   :  { %s1317_s13 = sld [smem:[#allocation3 + $0x11]] }
  0x21   :  { %s1319_s14 = sld [smem:[#allocation3 + $0x12]] }
  0x22   :  { %2098 = sst [smem:[#allocation10_spill]] %s1313_s11 }
  0x23   :  { %s1321_s15 = sld [smem:[#allocation3 + $0x13]] }
  0x24   :  { %s1323_s16 = sld [smem:[#allocation3 + $0x14]] }
  0x25   :  { %2099 = sst [smem:[#allocation11_spill]] %s1315_s12 }
  0x26   :  { %2100 = sst [smem:[#allocation12_spill]] %s1317_s13 }
  0x27   :  { %2101 = sst [smem:[#allocation13_spill]] %s1319_s14 }
  0x28   :  { %s1325_s17 = sld [smem:[#allocation3 + $0x15]] }
  0x29   :  { %2102 = sst [smem:[#allocation14_spill]] %s1321_s15 }
  0x2a   :  { %2103 = sst [smem:[#allocation15_spill]] %s1323_s16 }
  0x2b   :  { %s1327_s18 = sld [smem:[#allocation3 + $0x16]] }
  0x2c   :  { %s1329_s19 = sld [smem:[#allocation3 + $0x17]] }
  0x2d   :  { %s1331_s20 = sld [smem:[#allocation3 + $0x18]] }
  0x2e   :  { %2104 = sst [smem:[#allocation16_spill]] %s1325_s17 }
  0x2f   :  { %s1333_s21 = sld [smem:[#allocation3 + $0x19]] }
  0x30   :  { %s1335_s5 = sld [smem:[#allocation3 + $0x1a]] }
  0x31   :  { %2105 = sst [smem:[#allocation17_spill]] %s1327_s18 }
  0x32   :  { %2106 = sst [smem:[#allocation18_spill]] %s1329_s19 }
  0x33   :  { %2107 = sst [smem:[#allocation19_spill]] %s1331_s20 }
  0x34   :  { %s1337_s3 = sld [smem:[#allocation3 + $0x1b]] }
  0x35   :  { %s1339_s2 = sld [smem:[#allocation3 + $0x1c]] }
  0x36   :  { %2108 = sst [smem:[#allocation20_spill]] %s1335_s5 }
  0x37   :  { %s1341_s4 = sld [smem:[#allocation3 + $0x1d]] }
  0x38   :  { %s1343_s11 = sld [smem:[#allocation3 + $0x1e]] }
  0x39   :  { %s1345_s16 = sld [smem:[#allocation3 + $0x1f]] }
  0x3a   :  { %2109 = sst [smem:[#allocation21_spill]] %s1337_s3 }
  0x3b   :  { %2110 = sst [smem:[#allocation22_spill]] %s1339_s2 }
  0x3c   :  { %s1347_s17 = sld [smem:[#allocation3 + $0x20]] }
  0x3d   :  { %2111 = sst [smem:[#allocation23_spill]] %s1341_s4 }
  0x3e   :  { %2112 = sst [smem:[#allocation24_spill]] %s1343_s11 }
  0x3f   :  { %2113 = sst [smem:[#allocation25_spill]] %s1345_s16 }
  0x40   :  { %s1349_s18 = sld [smem:[#allocation3 + $0x21]] }
  0x41   :  { %s1351_s19 = sld [smem:[#allocation3 + $0x22]] }
  0x42   :  { %2114 = sst [smem:[#allocation26_spill]] %s1347_s17 }
  0x43   :  { %s1353_s15 = sld [smem:[#allocation3 + $0x23]] }
  0x44   :  { %s1355_s14 = sld [smem:[#allocation3 + $0x24]] }
  0x45   :  { %s1357_s5 = sld [smem:[#allocation3 + $0x25]] }
  0x46   :  { %2115 = sst [smem:[#allocation27_spill]] %s1349_s18 }
  0x47   :  { %2116 = sst [smem:[#allocation28_spill]] %s1351_s19 }
  0x48   :  { %s1359_s3 = sld [smem:[#allocation3 + $0x26]] }
  0x49   :  { %2117 = sst [smem:[#allocation29_spill]] %s1353_s15 }
  0x4a   :  { %2118 = sst [smem:[#allocation30_spill]] %s1355_s14 }
  0x4b   :  { %2119 = sst [smem:[#allocation31_spill]] %s1357_s5 }
  0x4c   :  { %s1361_s2 = sld [smem:[#allocation3 + $0x27]] }
  0x4d   :  { %s1363_s4 = sld [smem:[#allocation3 + $0x28]] }
  0x4e   :  { %2120 = sst [smem:[#allocation32_spill]] %s1359_s3 }
  0x4f   :  { %s1365_s11 = sld [smem:[#allocation3 + $0x29]] }
  0x50   :  { %s1367_s16 = sld [smem:[#allocation3 + $0x2a]] }
  0x51   :  { %s1369_s17 = sld [smem:[#allocation3 + $0x2b]] }
  0x52   :  { %2121 = sst [smem:[#allocation33_spill]] %s1361_s2 }
  0x53   :  { %2122 = sst [smem:[#allocation34_spill]] %s1363_s4 }
  0x54   :  { %s1371_s18 = sld [smem:[#allocation3 + $0x2c]] }
  0x55   :  { %2123 = sst [smem:[#allocation35_spill]] %s1365_s11 }
  0x56   :  { %2124 = sst [smem:[#allocation36_spill]] %s1367_s16 }
  0x57   :  { %2125 = sst [smem:[#allocation37_spill]] %s1369_s17 }
  0x58   :  { %s1373_s19 = sld [smem:[#allocation3 + $0x2d]] }
  0x59   :  { %s1375_s15 = sld [smem:[#allocation3 + $0x2e]] }
  0x5a   :  { %2126 = sst [smem:[#allocation38_spill]] %s1371_s18 }
  0x5b   :  { %s1377_s14 = sld [smem:[#allocation3 + $0x2f]] }
  0x5c   :  { %s1379_s5 = sld [smem:[#allocation3 + $0x30]] }
  0x5d   :  { %s1381_s3 = sld [smem:[#allocation3 + $0x31]] }
  0x5e   :  { %2127 = sst [smem:[#allocation39_spill]] %s1373_s19 }
  0x5f   :  { %2128 = sst [smem:[#allocation40_spill]] %s1375_s15 }
  0x60   :  { %s1383_s2 = sld [smem:[#allocation3 + $0x32]] }
  0x61   :  { %2129 = sst [smem:[#allocation41_spill]] %s1377_s14 }
  0x62   :  { %2130 = sst [smem:[#allocation42_spill]] %s1379_s5 }
  0x63   :  { %2131 = sst [smem:[#allocation43_spill]] %s1381_s3 }
  0x64   :  { %s1385_s4 = sld [smem:[#allocation3 + $0x33]] }
  0x65   :  { %s1387_s11 = sld [smem:[#allocation3 + $0x34]] }
  0x66   :  { %2132 = sst [smem:[#allocation44_spill]] %s1383_s2 }
  0x67   :  { %s1389_s16 = sld [smem:[#allocation3 + $0x35]] }
  0x68   :  { %s1391_s17 = sld [smem:[#allocation3 + $0x36]] }
  0x69   :  { %s1393_s18 = sld [smem:[#allocation3 + $0x37]] }
  0x6a   :  { %2133 = sst [smem:[#allocation45_spill]] %s1385_s4 }
  0x6b   :  { %2134 = sst [smem:[#allocation46_spill]] %s1387_s11 }
  0x6c   :  { %s1395_s19 = sld [smem:[#allocation3 + $0x38]] }
  0x6d   :  { %2135 = sst [smem:[#allocation47_spill]] %s1389_s16 }
  0x6e   :  { %2136 = sst [smem:[#allocation48_spill]] %s1391_s17 }
  0x6f   :  { %2137 = sst [smem:[#allocation49_spill]] %s1393_s18 }
  0x70   :  { %s1397_s15 = sld [smem:[#allocation3 + $0x39]] }
  0x71   :  { %s1399_s14 = sld [smem:[#allocation3 + $0x3a]] }
  0x72   :  { %2138 = sst [smem:[#allocation50_spill]] %s1395_s19 }
  0x73   :  { %s1401_s5 = sld [smem:[#allocation3 + $0x3b]] }
  0x74   :  { %s1403_s3 = sld [smem:[#allocation3 + $0x3c]] }
  0x75   :  { %s1405_s2 = sld [smem:[#allocation3 + $0x3d]] }
  0x76   :  { %2139 = sst [smem:[#allocation51_spill]] %s1397_s15 }
  0x77   :  { %2140 = sst [smem:[#allocation52_spill]] %s1399_s14 }
  0x78   :  { %s1407_s4 = sld [smem:[#allocation3 + $0x3e]] }
  0x79   :  { %2141 = sst [smem:[#allocation53_spill]] %s1401_s5 }
  0x7a   :  { %2142 = sst [smem:[#allocation54_spill]] %s1403_s3 }
  0x7b   :  { %2143 = sst [smem:[#allocation55_spill]] %s1405_s2 }
  0x7c   :  { %s1409_s11 = sld [smem:[#allocation3 + $0x3f]] }
  0x7d   :  { %s1411_s16 = sld [smem:[#allocation3 + $0x40]] }
  0x7e   :  { %2144 = sst [smem:[#allocation56_spill]] %s1407_s4 }
  0x7f   :  { %s1413_s17 = sld [smem:[#allocation3 + $0x41]] }
  0x80   :  { %s1415_s18 = sld [smem:[#allocation3 + $0x42]] }
  0x81   :  { %s1417_s19 = sld [smem:[#allocation3 + $0x43]] }
  0x82   :  { %2145 = sst [smem:[#allocation57_spill]] %s1409_s11 }
  0x83   :  { %2146 = sst [smem:[#allocation58_spill]] %s1411_s16 }
  0x84   :  { %s1419_s15 = sld [smem:[#allocation3 + $0x44]] }
  0x85   :  { %2147 = sst [smem:[#allocation59_spill]] %s1413_s17 }
  0x86   :  { %2148 = sst [smem:[#allocation60_spill]] %s1415_s18 }
  0x87   :  { %2149 = sst [smem:[#allocation61_spill]] %s1417_s19 }
  0x88   :  { %s1421_s14 = sld [smem:[#allocation3 + $0x45]] }
  0x89   :  { %s1423_s5 = sld [smem:[#allocation3 + $0x46]] }
  0x8a   :  { %2150 = sst [smem:[#allocation62_spill]] %s1419_s15 }
  0x8b   :  { %s1425_s3 = sld [smem:[#allocation3 + $0x47]] }
  0x8c   :  { %s1427_s2 = sld [smem:[#allocation3 + $0x48]] }
  0x8d   :  { %s1429_s4 = sld [smem:[#allocation3 + $0x49]] }
  0x8e   :  { %2151 = sst [smem:[#allocation63_spill]] %s1421_s14 }
  0x8f   :  { %2152 = sst [smem:[#allocation64_spill]] %s1423_s5 }
  0x90   :  { %s1431_s11 = sld [smem:[#allocation3 + $0x4a]] }
  0x91   :  { %2153 = sst [smem:[#allocation65_spill]] %s1425_s3 }
  0x92   :  { %2154 = sst [smem:[#allocation66_spill]] %s1427_s2 }
  0x93   :  { %2155 = sst [smem:[#allocation67_spill]] %s1429_s4 }
  0x94   :  { %s1433_s16 = sld [smem:[#allocation3 + $0x4b]] }
  0x95   :  { %s1435_s17 = sld [smem:[#allocation3 + $0x4c]] }
  0x96   :  { %2156 = sst [smem:[#allocation68_spill]] %s1431_s11 }
  0x97   :  { %s1437_s18 = sld [smem:[#allocation3 + $0x4d]] }
  0x98   :  { %s1439_s19 = sld [smem:[#allocation3 + $0x4e]] }
  0x99   :  { %s1441_s15 = sld [smem:[#allocation3 + $0x4f]] }
  0x9a   :  { %2157 = sst [smem:[#allocation69_spill]] %s1433_s16 }
  0x9b   :  { %2158 = sst [smem:[#allocation70_spill]] %s1435_s17 }
  0x9c   :  { %s1443_s14 = sld [smem:[#allocation3 + $0x50]] }
  0x9d   :  { %2159 = sst [smem:[#allocation71_spill]] %s1437_s18 }
  0x9e   :  { %2160 = sst [smem:[#allocation72_spill]] %s1439_s19 }
  0x9f   :  { %2161 = sst [smem:[#allocation73_spill]] %s1441_s15 }
  0xa0   :  { %s1445_s5 = sld [smem:[#allocation3 + $0x51]] }
  0xa1   :  { %s1447_s3 = sld [smem:[#allocation3 + $0x52]] }
  0xa2   :  { %2162 = sst [smem:[#allocation74_spill]] %s1443_s14 }
  0xa3   :  { %s1449_s2 = sld [smem:[#allocation3 + $0x53]] }
  0xa4   :  { %s1451_s4 = sld [smem:[#allocation3 + $0x54]] }
  0xa5   :  { %s1453_s11 = sld [smem:[#allocation3 + $0x55]] }
  0xa6   :  { %2163 = sst [smem:[#allocation75_spill]] %s1445_s5 }
  0xa7   :  { %2164 = sst [smem:[#allocation76_spill]] %s1447_s3 }
  0xa8   :  { %s1455_s16 = sld [smem:[#allocation3 + $0x56]] }
  0xa9   :  { %2165 = sst [smem:[#allocation77_spill]] %s1449_s2 }
  0xaa   :  { %2166 = sst [smem:[#allocation78_spill]] %s1451_s4 }
  0xab   :  { %2167 = sst [smem:[#allocation79_spill]] %s1453_s11 }
  0xac   :  { %s1457_s17 = sld [smem:[#allocation3 + $0x57]] }
  0xad   :  { %s1459_s18 = sld [smem:[#allocation3 + $0x58]] }
  0xae   :  { %2168 = sst [smem:[#allocation80_spill]] %s1455_s16 }
  0xaf   :  { %s1461_s19 = sld [smem:[#allocation3 + $0x59]] }
  0xb0   :  { %s1463_s15 = sld [smem:[#allocation3 + $0x5a]] }
  0xb1   :  { %s1465_s14 = sld [smem:[#allocation3 + $0x5b]] }
  0xb2   :  { %2169 = sst [smem:[#allocation81_spill]] %s1457_s17 }
  0xb3   :  { %2170 = sst [smem:[#allocation82_spill]] %s1459_s18 }
  0xb4   :  { %s1467_s5 = sld [smem:[#allocation3 + $0x5c]] }
  0xb5   :  { %2171 = sst [smem:[#allocation83_spill]] %s1461_s19 }
  0xb6   :  { %2172 = sst [smem:[#allocation84_spill]] %s1463_s15 }
  0xb7   :  { %2173 = sst [smem:[#allocation85_spill]] %s1465_s14 }
  0xb8   :  { %s1469_s3 = sld [smem:[#allocation3 + $0x5d]] }
  0xb9   :  { %s1471_s2 = sld [smem:[#allocation3 + $0x5e]] }
  0xba   :  { %2174 = sst [smem:[#allocation86_spill]] %s1467_s5 }
  0xbb   :  { %s1473_s4 = sld [smem:[#allocation3 + $0x5f]] }
  0xbc   :  { %s1475_s11 = sld [smem:[#allocation3 + $0x60]] }
  0xbd   :  { %s1477_s16 = sld [smem:[#allocation3 + $0x61]] }
  0xbe   :  { %2175 = sst [smem:[#allocation87_spill]] %s1469_s3 }
  0xbf   :  { %2176 = sst [smem:[#allocation88_spill]] %s1471_s2 }
  0xc0   :  { %s1479_s17 = sld [smem:[#allocation3 + $0x62]] }
  0xc1   :  { %2177 = sst [smem:[#allocation89_spill]] %s1473_s4 }
  0xc2   :  { %2178 = sst [smem:[#allocation90_spill]] %s1475_s11 }
  0xc3   :  { %2179 = sst [smem:[#allocation91_spill]] %s1477_s16 }
  0xc4   :  { %s1481_s18 = sld [smem:[#allocation3 + $0x63]] }
  0xc5   :  { %s1483_s19 = sld [smem:[#allocation3 + $0x64]] }
  0xc6   :  { %2180 = sst [smem:[#allocation92_spill]] %s1479_s17 }
  0xc7   :  { %s1485_s15 = sld [smem:[#allocation3 + $0x65]] }
  0xc8   :  { %s1487_s14 = sld [smem:[#allocation3 + $0x66]] }
  0xc9   :  { %s1489_s5 = sld [smem:[#allocation3 + $0x67]] }
  0xca   :  { %2181 = sst [smem:[#allocation93_spill]] %s1481_s18 }
  0xcb   :  { %2182 = sst [smem:[#allocation94_spill]] %s1483_s19 }
  0xcc   :  { %s1491_s3 = sld [smem:[#allocation3 + $0x68]] }
  0xcd   :  { %2183 = sst [smem:[#allocation95_spill]] %s1485_s15 }
  0xce   :  { %2184 = sst [smem:[#allocation96_spill]] %s1487_s14  ;;  %s1509_s14 = smov 0  }
  0xcf   :  { %2185 = sst [smem:[#allocation97_spill]] %s1489_s5 }
  0xd0   :  { %s1493_s2 = sld [smem:[#allocation3 + $0x69]] }
  0xd1   :  { %s1495_s4 = sld [smem:[#allocation3 + $0x6a]] }
  0xd2   :  { %2186 = sst [smem:[#allocation98_spill]] %s1491_s3 }
  0xd3   :  { %s1497_s11 = sld [smem:[#allocation3 + $0x6b]] }
  0xd4   :  { %s1499_s16 = sld [smem:[#allocation3 + $0x6c]] }
  0xd5   :  { %s1501_s17 = sld [smem:[#allocation3 + $0x6d]] }
  0xd6   :  { %2187 = sst [smem:[#allocation99_spill]] %s1493_s2 }
  0xd7   :  { %s1503_s18 = sld [smem:[#allocation3 + $0x6e]] }
  0xd8   :  { %s1505_s19 = sld [smem:[#allocation3 + $0x6f]] }
  0xd9   :  { %s1507_s15 = sld [smem:[#allocation3 + $0x70]] }
  0xdd   :  { %2188 = sst [smem:[#allocation100_spill]] %s1503_s18 }
  0xde   :  { %2189 = sst [smem:[#allocation101_spill]] %s1505_s19 }
  0xdf   :  { %2190 = sst [smem:[#allocation102_spill]] %s1507_s15 }
  0xe0 LB: > { %s2191_s22 = sld [smem:[#allocation6_spill]]  ;;  %s1515_s15 = sshll.u32 %s1247_s14, 3  ;;  %v156_v2 = vstv %s1299_s29  ;;  %v161_v3 = vstv %s1301_s30  ;;  %v164_v5 = vstv %s1287_s24  ;;  %v169_v7 = vstv %s1289_s25  ;;  %s1247_s14 = sphi %s1509_s14, %s150_s14  }
  0xe1   : > { %s2192_s23 = sld [smem:[#allocation7_spill]]  ;;  %v174_v11 = vstv %s1291_s26  ;;  %v176_v12 = vstv %s1307_s8  ;;  %v179_v13 = vstv %s1293_s27  ;;  %v181_v14 = vstv %s1309_s9  ;;  %s150_s14 = sadd.s32 1, %s1247_s14  }
  0xe2   : > { %s2193_s6 = sld [smem:[#allocation8_spill]]  ;;  %v184_v15 = vstv %s1295_s28  ;;  %v186_v16 = vstv %s1311_s10  ;;  %v189_v17 = vstv %s1297_s0  ;;  %v201_v30 = vstv %s1333_s21  ;;  %p147_p0 = scmp.ge.s32.totalorder %s150_s14, 4  }
  0xe3   : > { %s2194_s7 = sld [smem:[#allocation9_spill]] }
  0xe4   : > { %s2195_s1 = sld [smem:[#allocation103_spill]] }
  0xe5   : > { %s2196_s12 = sld [smem:[#allocation11_spill]] }
  0xe6   : > { %v154_v0 = vstv %s2191_s22  ;;  %s2197_s13 = sld [smem:[#allocation12_spill]] }
  0xe7   : > { %v159_v1 = vstv %s2192_s23  ;;  %s2198_s20 = sld [smem:[#allocation19_spill]] }
  0xe8   : > { %v166_v6 = vstv %s2193_s6  ;;  %s2199_s5 = sld [smem:[#allocation13_spill]] }
  0xe9   : > { %v171_v10 = vstv %s2194_s7  ;;  %s2201_s19 = sld [smem:[#allocation14_spill]] }
  0xea   : > { %s152_s18 = scalar_lea.vmem %s2195_s1, %s1515_s15  ;;  %s2202_s1 = sld [smem:[#allocation21_spill]] }
  0xeb   : > { %v1525_v4 = vld [vmem:[%s152_s18] sm:$0xff]  ;;  %s2200_s18 = sld [smem:[#allocation20_spill]]  ;;  %v194_v18 = vstv %s2196_s12 }
  0xec   : > { %v155_v8 = vmul.f32 %v154_v0, %v1525_v4  ;;  %v160_v9 = vmul.f32 %v159_v1, %v1525_v4  ;;  %v199_v19 = vstv %s2197_s13  ;;  %v165_v20 = vmul.f32 %v164_v5, %v1525_v4  ;;  %s2203_s6 = sld [smem:[#allocation15_spill]] }
  0xed   : > { %v170_v21 = vmul.f32 %v169_v7, %v1525_v4  ;;  %v1545_v22 = vmul.f32 %v174_v11, %v1525_v4  ;;  %v196_v23 = vstv %s2198_s20  ;;  %v1553_v26 = vmul.f32 %v179_v13, %v1525_v4  ;;  %s2204_s7 = sld [smem:[#allocation22_spill]] }
  0xee   : > { %v1548_v24 = vadd.f32 %v156_v2, %v155_v8  ;;  %v1550_v25 = vadd.f32 %v161_v3, %v160_v9  ;;  %v1556_v27 = vmul.f32 %v184_v15, %v1525_v4  ;;  %s2205_s12 = sld [smem:[#allocation16_spill]]  ;;  %v195_v28 = vmul.f32 %v194_v18, %v1525_v4 }
  0xef   : > { %v200_v29 = vmul.f32 %v199_v19, %v1525_v4  ;;  %v204_v31 = vstv %s2199_s5  ;;  %v209_v34 = vstv %s2201_s19  ;;  %s2206_s13 = sld [smem:[#allocation23_spill]]  ;;  %v1572_v45 = vadd.f32 %v166_v6, %v165_v20 }
  0xf0   : > { %v205_v32 = vmul.f32 %v204_v31, %v1525_v4  ;;  %v211_v35 = vstv %s2202_s1  ;;  %s2207_s20 = sld [smem:[#allocation17_spill]]  ;;  %v197_v36 = vadd.f32 %v196_v23, %v195_v28  ;;  %v210_v38 = vmul.f32 %v209_v34, %v1525_v4 }
  0xf1   : > { %v206_v33 = vstv %s2200_s18  ;;  %v202_v37 = vadd.f32 %v201_v30, %v200_v29  ;;  %s2208_s22 = sld [smem:[#allocation24_spill]]  ;;  %v158_v44 = vmax.f32 %v1548_v24, 0.0  ;;  %v1574_v46 = vadd.f32 %v171_v10, %v170_v21 }
  0xf2   : > { %v214_v39 = vstv %s2203_s6  ;;  %v207_v40 = vadd.f32 %v206_v33, %v205_v32  ;;  %s2209_s23 = sld [smem:[#allocation18_spill]]  ;;  %v1577_v48 = vmax.f32 %v197_v36, 0.0  ;;  %v212_v52 = vadd.f32 %v211_v35, %v210_v38 }
  0xf3   : > { %v215_v41 = vmul.f32 %v214_v39, %v1525_v4  ;;  %v216_v42 = vstv %s2204_s7  ;;  %s2210_s3 = sld [smem:[#allocation98_spill]]  ;;  %v1579_v49 = vmax.f32 %v202_v37, 0.0  ;;  %v239_v1 = vstv %s1495_s4 }
  0xf4   : > { %v219_v43 = vstv %s2205_s12  ;;  %s2211_s1 = sld [smem:[#allocation25_spill]]  ;;  %v1585_v56 = vmax.f32 %v207_v40, 0.0  ;;  %v242_v2 = vstv %s1497_s11  ;;  %v245_v3 = vstv %s1499_s16 }
  0xf5   : > { %v220_v47 = vmul.f32 %v219_v43, %v1525_v4  ;;  %s2212_s2 = sld [smem:[#allocation99_spill]]  ;;  %v221_v50 = vstv %s2206_s13  ;;  %v217_v53 = vadd.f32 %v216_v42, %v215_v41  ;;  %v1596_v5 = vmax.f32 %v212_v52, 0.0 }
  0xf6   : > { %v224_v51 = vstv %s2207_s20  ;;  %s2213_s6 = sld [smem:[#allocation26_spill]]  ;;  %v240_v8 = vmul.f32 %v239_v1, %v1585_v56  ;;  %v163_v9 = vmax.f32 %v1550_v25, 0.0  ;;  %v168_v10 = vmax.f32 %v1572_v45, 0.0 }
  0xf7   : > { %v225_v54 = vmul.f32 %v224_v51, %v1525_v4  ;;  %v226_v55 = vstv %s2208_s22  ;;  %v222_v57 = vadd.f32 %v221_v50, %v220_v47  ;;  %s2214_s7 = sld [smem:[#allocation27_spill]]  ;;  %v1598_v6 = vmax.f32 %v217_v53, 0.0 }
  0xf8   : > { %v229_v58 = vstv %s2209_s23  ;;  %s2215_s12 = sld [smem:[#allocation28_spill]]  ;;  %v243_v19 = vmul.f32 %v242_v2, %v1596_v5  ;;  %v248_v21 = vstv %s1501_s17 }
  0xf9   : > { %v234_v59 = vstv %s2210_s3  ;;  %v227_v60 = vadd.f32 %v226_v55, %v225_v54  ;;  %v230_v61 = vmul.f32 %v229_v58, %v1525_v4  ;;  %s2216_s22 = sld [smem:[#allocation100_spill]]  ;;  %v1604_v11 = vmax.f32 %v222_v57, 0.0 }
  0xfa   : > { %v231_v62 = vstv %s2211_s1  ;;  %v235_v63 = vmul.f32 %v234_v59, %v1577_v48  ;;  %s2217_s23 = sld [smem:[#allocation29_spill]]  ;;  %v246_v20 = vmul.f32 %v245_v3, %v1598_v6 }
  0xfb   : > { %v236_v0 = vstv %s2212_s2  ;;  %s2218_s13 = sld [smem:[#allocation30_spill]]  ;;  %v1606_v13 = vmax.f32 %v227_v60, 0.0  ;;  %v232_v15 = vadd.f32 %v231_v62, %v230_v61  ;;  %v249_v42 = vmul.f32 %v248_v21, %v1604_v11 }
  0xfc   : > { %v237_v7 = vmul.f32 %v236_v0, %v1579_v49  ;;  %s2219_s20 = sld [smem:[#allocation31_spill]]  ;;  %v257_v23 = vstv %s2213_s6 }
  0xfd   : > { %v259_v28 = vstv %s2214_s7  ;;  %s2220_s5 = sld [smem:[#allocation101_spill]]  ;;  %v258_v32 = vmul.f32 %v257_v23, %v1577_v48  ;;  %v1621_v38 = vmax.f32 %v232_v15, 0.0 }
  0xfe   : > { %v238_v18 = vadd.f32 %v237_v7, %v235_v63  ;;  %v262_v29 = vstv %s2215_s12  ;;  %v260_v33 = vmul.f32 %v259_v28, %v1579_v49  ;;  %s2221_s18 = sld [smem:[#allocation32_spill]] }
  0xff   : > { %v251_v31 = vstv %s2216_s22  ;;  %v263_v34 = vmul.f32 %v262_v29, %v1585_v56  ;;  %s2222_s19 = sld [smem:[#allocation34_spill]] }
 0x100   : > { %v241_v30 = vadd.f32 %v240_v8, %v238_v18  ;;  %v265_v35 = vstv %s2217_s23  ;;  %s2223_s1 = sld [smem:[#allocation35_spill]]  ;;  %v261_v40 = vadd.f32 %v260_v33, %v258_v32  ;;  %v252_v43 = vmul.f32 %v251_v31, %v1606_v13 }
 0x101   : > { %v268_v36 = vstv %s2218_s13  ;;  %s2224_s2 = sld [smem:[#allocation36_spill]]  ;;  %v266_v41 = vmul.f32 %v265_v35, %v1596_v5 }
 0x102   : > { %v271_v37 = vstv %s2219_s20  ;;  %s2225_s3 = sld [smem:[#allocation37_spill]]  ;;  %v244_v39 = vadd.f32 %v243_v19, %v241_v30  ;;  %v269_v50 = vmul.f32 %v268_v36, %v1598_v6  ;;  %v264_v52 = vadd.f32 %v263_v34, %v261_v40 }
 0x103   : > { %s2226_s6 = sld [smem:[#allocation33_spill]]  ;;  %v254_v47 = vstv %s2220_s5  ;;  %v272_v53 = vmul.f32 %v271_v37, %v1604_v11 }
 0x104   : > { %s2227_s7 = sld [smem:[#allocation38_spill]]  ;;  %v247_v51 = vadd.f32 %v246_v20, %v244_v39  ;;  %v274_v54 = vstv %s2221_s18  ;;  %v267_v60 = vadd.f32 %v266_v41, %v264_v52  ;;  %v255_v0 = vmul.f32 %v254_v47, %v1621_v38 }
 0x105   : > { %s2228_s12 = sld [smem:[#allocation39_spill]]  ;;  %v284_v55 = vstv %s2222_s19  ;;  %v275_v8 = vmul.f32 %v274_v54, %v1606_v13 }
 0x106   : > { %v286_v57 = vstv %s2223_s1  ;;  %s2229_s22 = sld [smem:[#allocation40_spill]]  ;;  %v285_v62 = vmul.f32 %v284_v55, %v1577_v48  ;;  %v270_v7 = vadd.f32 %v269_v50, %v267_v60  ;;  %v250_v19 = vadd.f32 %v249_v42, %v247_v51 }
 0x107   : > { %v289_v58 = vstv %s2224_s2  ;;  %v287_v63 = vmul.f32 %v286_v57, %v1579_v49  ;;  %s2230_s23 = sld [smem:[#allocation41_spill]] }
 0x108   : > { %v292_v59 = vstv %s2225_s3  ;;  %v290_v1 = vmul.f32 %v289_v58, %v1585_v56  ;;  %s2231_s13 = sld [smem:[#allocation42_spill]]  ;;  %v273_v28 = vadd.f32 %v272_v53, %v270_v7  ;;  %v253_v55 = vadd.f32 %v252_v43, %v250_v19 }
 0x109   : > { %v277_v61 = vstv %s2226_s6  ;;  %s2232_s20 = sld [smem:[#allocation43_spill]]  ;;  %v288_v15 = vadd.f32 %v287_v63, %v285_v62  ;;  %v293_v18 = vmul.f32 %v292_v59, %v1596_v5 }
 0x10a   : > { %v295_v2 = vstv %s2227_s7  ;;  %s2233_s5 = sld [smem:[#allocation44_spill]]  ;;  %v278_v20 = vmul.f32 %v277_v61, %v1621_v38  ;;  %v276_v36 = vadd.f32 %v275_v8, %v273_v28 }
 0x10b   : > { %v298_v3 = vstv %s2228_s12  ;;  %s2234_s2 = sld [smem:[#allocation45_spill]]  ;;  %v296_v21 = vmul.f32 %v295_v2, %v1598_v6  ;;  %v291_v29 = vadd.f32 %v290_v1, %v288_v15 }
 0x10c   : > { %s2235_s3 = sld [smem:[#allocation46_spill]]  ;;  %v301_v23 = vstv %s2229_s22  ;;  %v299_v30 = vmul.f32 %v298_v3, %v1604_v11  ;;  %v279_v51 = vadd.f32 %v278_v20, %v276_v36 }
 0x10d   : > { %s2236_s18 = sld [smem:[#allocation47_spill]]  ;;  %v304_v31 = vstv %s2230_s23  ;;  %v302_v32 = vmul.f32 %v301_v23, %v1606_v13  ;;  %v294_v37 = vadd.f32 %v293_v18, %v291_v29 }
 0x10e   : > { %v311_v33 = vstv %s2231_s13  ;;  %s2237_s19 = sld [smem:[#allocation90_spill]]  ;;  %v305_v58 = vmul.f32 %v304_v31, %v1621_v38 }
 0x10f   : > { %v313_v34 = vstv %s2232_s20  ;;  %s2238_s1 = sld [smem:[#allocation91_spill]]  ;;  %v312_v39 = vmul.f32 %v311_v33, %v1577_v48  ;;  %v297_v52 = vadd.f32 %v296_v21, %v294_v37  ;;  %v256_v33 = vadd.f32 %v255_v0, %v253_v55 }
 0x110   : > { %v316_v35 = vstv %s2233_s5  ;;  %v314_v40 = vmul.f32 %v313_v34, %v1579_v49  ;;  %s2239_s6 = sld [smem:[#allocation48_spill]] }
 0x111   : > { %v317_v41 = vmul.f32 %v316_v35, %v1585_v56  ;;  %v319_v42 = vstv %s2234_s2  ;;  %s2240_s7 = sld [smem:[#allocation49_spill]]  ;;  %v300_v60 = vadd.f32 %v299_v30, %v297_v52 }
 0x112   : > { %v322_v47 = vstv %s2235_s3  ;;  %s2241_s12 = sld [smem:[#allocation50_spill]]  ;;  %v315_v53 = vadd.f32 %v314_v40, %v312_v39  ;;  %v320_v54 = vmul.f32 %v319_v42, %v1596_v5 }
 0x113   : > { %v325_v50 = vstv %s2236_s18  ;;  %s2242_s22 = sld [smem:[#allocation51_spill]]  ;;  %v323_v62 = vmul.f32 %v322_v47, %v1598_v6  ;;  %v303_v43 = vadd.f32 %v302_v32, %v300_v60 }
 0x114   : > { %v280_v57 = vstv %s2237_s19  ;;  %s2243_s23 = sld [smem:[#allocation52_spill]]  ;;  %v318_v61 = vadd.f32 %v317_v41, %v315_v53  ;;  %v326_v1 = vmul.f32 %v325_v50, %v1604_v11 }
 0x115   : > { %v307_v59 = vstv %s2238_s1  ;;  %s2244_s13 = sld [smem:[#allocation53_spill]]  ;;  %v281_v8 = vadd.f32 %v280_v57, %v279_v51  ;;  %v306_v28 = vadd.f32 %v305_v58, %v303_v43 }
 0x116   : > { %v328_v63 = vstv %s2239_s6  ;;  %s2245_s20 = sld [smem:[#allocation54_spill]]  ;;  %v321_v15 = vadd.f32 %v320_v54, %v318_v61 }
 0x117   : > { %v331_v2 = vstv %s2240_s7  ;;  %s2246_s5 = sld [smem:[#allocation55_spill]]  ;;  %v329_v19 = vmul.f32 %v328_v63, %v1606_v13  ;;  %v282_v41 = vmul.f32 %v281_v8, %v158_v44  ;;  %v308_v42 = vadd.f32 %v307_v59, %v306_v28 }
 0x118   : > { %v338_v3 = vstv %s2241_s12  ;;  %s2247_s2 = sld [smem:[#allocation92_spill]]  ;;  %v324_v29 = vadd.f32 %v323_v62, %v321_v15  ;;  %v332_v37 = vmul.f32 %v331_v2, %v1621_v38 }
 0x119   : > { %v340_v7 = vstv %s2242_s22  ;;  %v339_v18 = vmul.f32 %v338_v3, %v1577_v48  ;;  %s2248_s3 = sld [smem:[#allocation56_spill]]  ;;  %v283_v2 = vadd.f32 %v282_v41, %v256_v33  ;;  %v309_v43 = vmul.f32 %v308_v42, %v163_v9 }
 0x11a   : > { %v341_v20 = vmul.f32 %v340_v7, %v1579_v49  ;;  %v343_v21 = vstv %s2243_s23  ;;  %s2249_s18 = sld [smem:[#allocation58_spill]]  ;;  %v327_v36 = vadd.f32 %v326_v1, %v324_v29 }
 0x11b   : > { %v346_v23 = vstv %s2244_s13  ;;  %v344_v30 = vmul.f32 %v343_v21, %v1585_v56  ;;  %s2250_s19 = sld [smem:[#allocation59_spill]] }
 0x11c   : > { %v349_v31 = vstv %s2245_s20  ;;  %v342_v34 = vadd.f32 %v341_v20, %v339_v18  ;;  %v347_v32 = vmul.f32 %v346_v23, %v1596_v5  ;;  %s2251_s1 = sld [smem:[#allocation60_spill]]  ;;  %v330_v50 = vadd.f32 %v329_v19, %v327_v36 }
 0x11d   : > { %v352_v35 = vstv %s2246_s5  ;;  %s2252_s6 = sld [smem:[#allocation57_spill]]  ;;  %v350_v0 = vmul.f32 %v349_v31, %v1598_v6 }
 0x11e   : > { %v334_v39 = vstv %s2247_s2  ;;  %s2253_s7 = sld [smem:[#allocation61_spill]]  ;;  %v345_v47 = vadd.f32 %v344_v30, %v342_v34  ;;  %v353_v51 = vmul.f32 %v352_v35, %v1604_v11  ;;  %v333_v44 = vadd.f32 %v332_v37, %v330_v50 }
 0x11f   : > { %v355_v40 = vstv %s2248_s3  ;;  %s2254_s12 = sld [smem:[#allocation62_spill]]  ;;  %v1718_v50 = vadd.f32 %v176_v12, %v1545_v22 }
 0x120   : > { %s2255_s22 = sld [smem:[#allocation63_spill]]  ;;  %v356_v52 = vmul.f32 %v355_v40, %v1606_v13  ;;  %v365_v53 = vstv %s2249_s18  ;;  %v348_v54 = vadd.f32 %v347_v32, %v345_v47  ;;  %v335_v20 = vadd.f32 %v334_v39, %v333_v44 }
 0x121   : > { %s2256_s23 = sld [smem:[#allocation93_spill]]  ;;  %v366_v55 = vmul.f32 %v365_v53, %v1577_v48  ;;  %v367_v57 = vstv %s2250_s19 }
 0x122   : > { %v370_v24 = vstv %s2251_s1  ;;  %s2257_s13 = sld [smem:[#allocation64_spill]]  ;;  %v368_v59 = vmul.f32 %v367_v57, %v1579_v49  ;;  %v351_v61 = vadd.f32 %v350_v0, %v348_v54  ;;  %v173_v0 = vmax.f32 %v1574_v46, 0.0 }
 0x123   : > { %v358_v58 = vstv %s2252_s6  ;;  %v371_v60 = vmul.f32 %v370_v24, %v1585_v56  ;;  %s2258_s20 = sld [smem:[#allocation65_spill]]  ;;  %v336_v24 = vmul.f32 %v335_v20, %v168_v10 }
 0x124   : > { %v373_v62 = vstv %s2253_s7  ;;  %s2259_s5 = sld [smem:[#allocation66_spill]]  ;;  %v369_v7 = vadd.f32 %v368_v59, %v366_v55  ;;  %v354_v15 = vadd.f32 %v353_v51, %v351_v61  ;;  %v359_v18 = vmul.f32 %v358_v58, %v1621_v38 }
 0x125   : > { %v376_v63 = vstv %s2254_s12  ;;  %s2260_s2 = sld [smem:[#allocation67_spill]]  ;;  %v374_v8 = vmul.f32 %v373_v62, %v1596_v5  ;;  %v310_v51 = vadd.f32 %v309_v43, %v283_v2 }
 0x126   : > { %v379_v1 = vstv %s2255_s22  ;;  %s2261_s3 = sld [smem:[#allocation68_spill]]  ;;  %v372_v21 = vadd.f32 %v371_v60, %v369_v7  ;;  %v377_v23 = vmul.f32 %v376_v63, %v1598_v6  ;;  %v357_v29 = vadd.f32 %v356_v52, %v354_v15 }
 0x127   : > { %v361_v3 = vstv %s2256_s23  ;;  %s2262_s18 = sld [smem:[#allocation69_spill]]  ;;  %v380_v28 = vmul.f32 %v379_v1, %v1604_v11  ;;  %v178_v7 = vmax.f32 %v1718_v50, 0.0 }
 0x128   : > { %v382_v19 = vstv %s2257_s13  ;;  %s2263_s19 = sld [smem:[#allocation70_spill]]  ;;  %v375_v25 = vadd.f32 %v374_v8, %v372_v21  ;;  %v360_v35 = vadd.f32 %v359_v18, %v357_v29  ;;  %v182_v8 = vadd.f32 %v181_v14, %v1553_v26 }
 0x129   : > { %v385_v30 = vstv %s2258_s20  ;;  %s2264_s1 = sld [smem:[#allocation71_spill]]  ;;  %v383_v9 = vmul.f32 %v382_v19, %v1606_v13 }
 0x12a   : > { %v392_v31 = vstv %s2259_s5  ;;  %s2265_s6 = sld [smem:[#allocation72_spill]]  ;;  %v378_v40 = vadd.f32 %v377_v23, %v375_v25  ;;  %v362_v44 = vadd.f32 %v361_v3, %v360_v35  ;;  %v386_v46 = vmul.f32 %v385_v30, %v1621_v38 }
 0x12b   : > { %v394_v33 = vstv %s2260_s2  ;;  %v393_v34 = vmul.f32 %v392_v31, %v1577_v48  ;;  %s2266_s7 = sld [smem:[#allocation74_spill]]  ;;  %v337_v23 = vadd.f32 %v336_v24, %v310_v51 }
 0x12c   : > { %v395_v32 = vmul.f32 %v394_v33, %v1579_v49  ;;  %v397_v36 = vstv %s2261_s3  ;;  %s2267_s12 = sld [smem:[#allocation75_spill]]  ;;  %v381_v53 = vadd.f32 %v380_v28, %v378_v40  ;;  %v363_v28 = vmul.f32 %v362_v44, %v173_v0 }
 0x12d   : > { %v400_v37 = vstv %s2262_s18  ;;  %v398_v42 = vmul.f32 %v397_v36, %v1585_v56  ;;  %s2268_s22 = sld [smem:[#allocation76_spill]] }
 0x12e   : > { %v403_v39 = vstv %s2263_s19  ;;  %v396_v41 = vadd.f32 %v395_v32, %v393_v34  ;;  %v401_v47 = vmul.f32 %v400_v37, %v1596_v5  ;;  %s2269_s23 = sld [smem:[#allocation77_spill]]  ;;  %v384_v22 = vadd.f32 %v383_v9, %v381_v53 }
 0x12f   : > { %v406_v52 = vstv %s2264_s1  ;;  %s2270_s13 = sld [smem:[#allocation73_spill]]  ;;  %v404_v55 = vmul.f32 %v403_v39, %v1598_v6  ;;  %v183_v53 = vmax.f32 %v182_v8, 0.0 }
 0x130   : > { %v399_v54 = vadd.f32 %v398_v42, %v396_v41  ;;  %v409_v57 = vstv %s2265_s6  ;;  %s2271_s20 = sld [smem:[#allocation78_spill]]  ;;  %v407_v59 = vmul.f32 %v406_v52, %v1604_v11  ;;  %v387_v43 = vadd.f32 %v386_v46, %v384_v22 }
 0x131   : > { %v419_v12 = vstv %s2266_s7  ;;  %s2272_s5 = sld [smem:[#allocation94_spill]]  ;;  %v410_v61 = vmul.f32 %v409_v57, %v1606_v13  ;;  %v364_v57 = vadd.f32 %v363_v28, %v337_v23 }
 0x132   : > { %v402_v58 = vadd.f32 %v401_v47, %v399_v54  ;;  %v420_v60 = vmul.f32 %v419_v12, %v1577_v48  ;;  %v421_v62 = vstv %s2267_s12  ;;  %s2273_s2 = sld [smem:[#allocation79_spill]] }
 0x133   : > { %v424_v63 = vstv %s2268_s22  ;;  %v422_v2 = vmul.f32 %v421_v62, %v1579_v49  ;;  %s2274_s3 = sld [smem:[#allocation80_spill]] }
 0x134   : > { %v427_v1 = vstv %s2269_s23  ;;  %v405_v45 = vadd.f32 %v404_v55, %v402_v58  ;;  %v425_v3 = vmul.f32 %v424_v63, %v1585_v56  ;;  %s2275_s18 = sld [smem:[#allocation82_spill]] }
 0x135   : > { %v412_v10 = vstv %s2270_s13  ;;  %s2276_s19 = sld [smem:[#allocation83_spill]]  ;;  %v423_v20 = vadd.f32 %v422_v2, %v420_v60  ;;  %v428_v21 = vmul.f32 %v427_v1, %v1596_v5 }
 0x136   : > { %v430_v15 = vstv %s2271_s20  ;;  %s2277_s1 = sld [smem:[#allocation84_spill]]  ;;  %v408_v19 = vadd.f32 %v407_v59, %v405_v45  ;;  %v413_v29 = vmul.f32 %v412_v10, %v1621_v38 }
 0x137   : > { %v388_v18 = vstv %s2272_s5  ;;  %s2278_s6 = sld [smem:[#allocation85_spill]]  ;;  %v426_v14 = vadd.f32 %v425_v3, %v423_v20  ;;  %v431_v26 = vmul.f32 %v430_v15, %v1598_v6 }
 0x138   : > { %s2279_s7 = sld [smem:[#allocation81_spill]]  ;;  %v433_v30 = vstv %s2273_s2  ;;  %v411_v31 = vadd.f32 %v410_v61, %v408_v19  ;;  %v389_v25 = vadd.f32 %v388_v18, %v387_v43 }
 0x139   : > { %s2280_s12 = sld [smem:[#allocation95_spill]]  ;;  %v436_v33 = vstv %s2274_s3  ;;  %v429_v35 = vadd.f32 %v428_v21, %v426_v14  ;;  %v434_v36 = vmul.f32 %v433_v30, %v1604_v11 }
 0x13a   : > { %s2281_s22 = sld [smem:[#allocation86_spill]]  ;;  %v446_v9 = vstv %s2275_s18  ;;  %v414_v40 = vadd.f32 %v413_v29, %v411_v31  ;;  %v437_v51 = vmul.f32 %v436_v33, %v1606_v13  ;;  %v390_v44 = vmul.f32 %v389_v25, %v178_v7 }
 0x13b   : > { %v448_v34 = vstv %s2276_s19  ;;  %v447_v37 = vmul.f32 %v446_v9, %v1577_v48  ;;  %s2282_s23 = sld [smem:[#allocation87_spill]]  ;;  %v432_v50 = vadd.f32 %v431_v26, %v429_v35  ;;  %v187_v48 = vadd.f32 %v186_v16, %v1556_v27 }
 0x13c   : > { %v451_v32 = vstv %s2277_s1  ;;  %v449_v42 = vmul.f32 %v448_v34, %v1579_v49  ;;  %s2283_s13 = sld [smem:[#allocation88_spill]]  ;;  %v190_v16 = vmul.f32 %v189_v17, %v1525_v4  ;;  %v391_v45 = vadd.f32 %v390_v44, %v364_v57 }
 0x13d   : > { %v454_v39 = vstv %s2278_s6  ;;  %v452_v47 = vmul.f32 %v451_v32, %v1585_v56  ;;  %s2284_s20 = sld [smem:[#allocation96_spill]]  ;;  %v435_v49 = vadd.f32 %v434_v36, %v432_v50  ;;  %v188_v61 = vmax.f32 %v187_v48, 0.0 }
 0x13e   : > { %v439_v41 = vstv %s2279_s7  ;;  %v450_v54 = vadd.f32 %v449_v42, %v447_v37  ;;  %v455_v55 = vmul.f32 %v454_v39, %v1596_v5  ;;  %s2285_s5 = sld [smem:[#allocation10_spill]] }
 0x13f   : > { %v415_v0 = vstv %s2280_s12  ;;  %s2286_s2 = sld [smem:[#allocation89_spill]]  ;;  %v440_v56 = vmul.f32 %v439_v41, %v1621_v38  ;;  %v438_v58 = vadd.f32 %v437_v51, %v435_v49  ;;  %s496_s12 = scalar_lea.vmem [#allocation2], %s1515_s15 }
 0x140   : > { %v457_v52 = vstv %s2281_s22  ;;  %v416_v46 = vadd.f32 %v415_v0, %v414_v40  ;;  %v453_v12 = vadd.f32 %v452_v47, %v450_v54  ;;  %s2287_s3 = sld [smem:[#allocation97_spill]] }
 0x141   : > { %v460_v24 = vstv %s2282_s23  ;;  %v458_v22 = vmul.f32 %v457_v52, %v1598_v6  ;;  %v441_v63 = vadd.f32 %v440_v56, %v438_v58  ;;  %s2288_s18 = sld [smem:[#allocation102_spill]] }
 0x142   : > { %v463_v59 = vstv %s2283_s13  ;;  %v456_v60 = vadd.f32 %v455_v55, %v453_v12  ;;  %v461_v5 = vmul.f32 %v460_v24, %v1604_v11  ;;  %v417_v10 = vmul.f32 %v416_v46, %v183_v53  ;;  %s2289_s6 = sld [smem:[#allocation106_spill]] }
 0x143   : > { %v442_v27 = vstv %s2284_s20  ;;  %v464_v6 = vmul.f32 %v463_v59, %v1606_v13  ;;  %s2290_s13 = sld [smem:[#allocation104_spill]] (%p147_p0) }
 0x144   : > { %v191_v62 = vstv %s2285_s5  ;;  %v459_v2 = vadd.f32 %v458_v22, %v456_v60  ;;  %v443_v3 = vadd.f32 %v442_v27, %v441_v63  ;;  %v418_v43 = vadd.f32 %v417_v10, %v391_v45  ;;  %s2291_s5 = sld [smem:[#allocation105_spill]] (%p147_p0) }
 0x145   : > { %v466_v1 = vstv %s2286_s2  ;;  %v192_v7 = vadd.f32 %v191_v62, %v190_v16  ;;  %s2292_s14 = sld [smem:[#allocation107_spill]] (%p147_p0) }
 0x146   : > { %v462_v8 = vadd.f32 %v461_v5, %v459_v2  ;;  %v467_v17 = vmul.f32 %v466_v1, %v1621_v38  ;;  %v444_v15 = vmul.f32 %v443_v3, %v188_v61  ;;  %v469_v11 = vstv %s2287_s3 }
 0x147   : > { %v193_v19 = vmax.f32 %v192_v7, 0.0  ;;  %v473_v29 = vstv %s2288_s18 }
 0x148   : > { %v465_v18 = vadd.f32 %v464_v6, %v462_v8  ;;  %v445_v21 = vadd.f32 %v444_v15, %v418_v43  ;;  %s493_s7 = scalar_lea.vmem %s2289_s6, %s1515_s15 }
 0x149   :  { %v517_v42 = vld [vmem:[%s2290_s13 + $0x78] sm:$0xff] (%p147_p0)  ;;  %v516_v47 = vld [vmem:[%s2290_s13 + $0x70] sm:$0xff] (%p147_p0)  ;;  %v514_v52 = vld [vmem:[%s2290_s13 + $0x60] sm:$0xff] (%p147_p0) }
 0x14a   : > { %v468_v20 = vadd.f32 %v467_v17, %v465_v18  ;;  %v1796_v0 = vand.u32 (%p147_p0), 4294901760, %v517_v42  ;;  %v1798_v50 = vand.u32 (%p147_p0), 4294901760, %v516_v47  ;;  %v513_v53 = vld [vmem:[%s2290_s13 + $0x58] sm:$0xff] (%p147_p0)  ;;  %v512_v48 = vld [vmem:[%s2290_s13 + $0x50] sm:$0xff] (%p147_p0)  ;;  %v1811_v54 = vand.u32 (%p147_p0), 4294901760, %v514_v52  ;;  %v511_v49 = vld [vmem:[%s2290_s13 + $0x48] sm:$0xff] (%p147_p0) }
 0x14b   :  { %v1813_v55 = vand.u32 (%p147_p0), 4294901760, %v513_v53  ;;  %v1815_v57 = vand.u32 (%p147_p0), 4294901760, %v512_v48  ;;  %v510_v56 = vld [vmem:[%s2290_s13 + $0x40] sm:$0xff] (%p147_p0)  ;;  %v1828_v12 = vand.u32 (%p147_p0), 4294901760, %v511_v49  ;;  %v509_v22 = vld [vmem:[%s2290_s13 + $0x38] sm:$0xff] (%p147_p0)  ;;  %v508_v45 = vld [vmem:[%s2290_s13 + $0x30] sm:$0xff] (%p147_p0) }
 0x14c   : > { %v470_v23 = vadd.f32 %v469_v11, %v468_v20  ;;  %523 = vmatpush.msra.mxu0 (%p147_p0), %v1796_v0  ;;  %v588_v24 = vsub.f32 (%p147_p0), %v517_v42, %v1796_v0  ;;  %v594_v44 = vsub.f32 (%p147_p0), %v516_v47, %v1798_v50  ;;  %770 = vmatpush.msra.mxu3 (%p147_p0), %v1796_v0  ;;  %v1836_v27 = vand.u32 (%p147_p0), 4294901760, %v510_v56  ;;  %v507_v17 = vld [vmem:[%s2290_s13 + $0x28] sm:$0xff] (%p147_p0) }
 0x14d   :  { %v606_v58 = vsub.f32 (%p147_p0), %v514_v52, %v1811_v54  ;;  %v612_v59 = vsub.f32 (%p147_p0), %v513_v53, %v1813_v55  ;;  %v618_v16 = vsub.f32 (%p147_p0), %v512_v48, %v1815_v57  ;;  %v624_v63 = vsub.f32 (%p147_p0), %v511_v49, %v1828_v12  ;;  %v502_v48 = vld [vmem:[%s2290_s13] sm:$0xff] (%p147_p0) }
 0x14e   : > { %v471_v28 = vmul.f32 %v470_v23, %v193_v19  ;;  %525 = vmatpush.msra.mxu0 (%p147_p0), %v1798_v50  ;;  %702 = vmatpush.msra.mxu2 (%p147_p0), %v588_v24  ;;  %v1839_v60 = vand.u32 (%p147_p0), 4294901760, %v588_v24  ;;  %v1841_v5 = vand.u32 (%p147_p0), 4294901760, %v594_v44  ;;  %v1849_v1 = vand.u32 (%p147_p0), 4294901760, %v509_v22 }
 0x14f   :  { %772 = vmatpush.msra.mxu3 (%p147_p0), %v1798_v50  ;;  %v1846_v62 = vand.u32 (%p147_p0), 4294901760, %v606_v58  ;;  %v1858_v3 = vand.u32 (%p147_p0), 4294901760, %v612_v59  ;;  %v1862_v7 = vsub.f32 (%p147_p0), %v510_v56, %v1836_v27  ;;  %v1864_v8 = vand.u32 (%p147_p0), 4294901760, %v618_v16 }
 0x150   : > { %v472_v30 = vadd.f32 %v471_v28, %v445_v21  ;;  %705 = vmatpush.msra.mxu2 (%p147_p0), %v594_v44  ;;  %v590_v10 = vsub.f32 (%p147_p0), %v588_v24, %v1839_v60  ;;  %v596_v2 = vsub.f32 (%p147_p0), %v594_v44, %v1841_v5  ;;  %v1871_v11 = vand.u32 (%p147_p0), 4294901760, %v508_v45  ;;  %v506_v21 = vld [vmem:[%s2290_s13 + $0x20] sm:$0xff] (%p147_p0) }
 0x151   :  { %v608_v18 = vsub.f32 (%p147_p0), %v606_v58, %v1846_v62  ;;  %v1875_v19 = vsub.f32 (%p147_p0), %v509_v22, %v1849_v1  ;;  %v1877_v20 = vand.u32 (%p147_p0), 4294901760, %v624_v63  ;;  %v614_v28 = vsub.f32 (%p147_p0), %v612_v59, %v1858_v3 }
 0x152   : > { %v474_v31 = vadd.f32 %v473_v29, %v472_v30  ;;  %v591_v43 = vand.u32 (%p147_p0), 4294901760, %v590_v10  ;;  %v597_v15 = vand.u32 (%p147_p0), 4294901760, %v596_v2  ;;  %v1884_v29 = vand.u32 (%p147_p0), 4294901760, %v507_v17 }
 0x153   :  { %v620_v30 = vsub.f32 (%p147_p0), %v618_v16, %v1864_v8 }
 0x154   : > { %v475_v14 = vsub.f32 0.0, %v474_v31  ;;  %592 = vmatpush.msra.mxu1 (%p147_p0), %v591_v43  ;;  %v1889_v31 = vand.u32 (%p147_p0), 4294901760, %v1862_v7 }
 0x156   : > { %v476_v26 = vmul.f32 1.442695, %v475_v14  ;;  %v505_v14 = vld [vmem:[%s2290_s13 + $0x18] sm:$0xff] (%p147_p0)  ;;  %598 = vmatpush.msra.mxu1 (%p147_p0), %v597_v15 }
 0x158   : > { %1206 = vpow2.f32 %v476_v26  ;;  %v609_v26 = vand.u32 (%p147_p0), 4294901760, %v608_v18 }
 0x15e   : > { %v1207_v13 = vpop.eup %1206 }
 0x15f   : > { %v478_v33 = vadd.f32 1.0, %v1207_v13  ;;  %v642_v13 = vsub.f32 (%p147_p0), %v508_v45, %v1871_v11 }
 0x161   : > { %1208 = vrcp.f32 %v478_v33  ;;  %v490_v9 = vand.u32 2147483648, %v478_v33  ;;  %vm484_vm0 = vweird.f32 %v478_v33  ;;  %v488_v32 = vand.u32 2147483647, %v478_v33 }
 0x162   :  { %v1920_v47 = vand.u32 (%p147_p0), 4294901760, %v642_v13 }
 0x163   : > { %v491_v36 = vor.u32 1.1754944e-38, %v490_v9  ;;  %vm489_vm3 = vcmp.eq.f32.partialorder %v488_v32, 8.507059e+37  ;;  %v504_v9 = vld [vmem:[%s2290_s13 + $0x10] sm:$0xff] (%p147_p0)  ;;  %v615_v32 = vand.u32 (%p147_p0), 4294901760, %v614_v28 }
 0x164   :  { %v1918_v42 = vand.u32 (%p147_p0), 4294901760, %v504_v9  ;;  %v644_v22 = vsub.f32 (%p147_p0), %v642_v13, %v1920_v47 }
 0x166   :  { %v645_v43 = vand.u32 (%p147_p0), 4294901760, %v644_v22 }
 0x167   : > { %v1209_v38 = vpop.eup %1208 }
 0x168   : > { %v480_v25 = vmul.f32 %v1209_v38, %v478_v33  ;;  %vm485_vm1 = vweird.f32 %v1209_v38  ;;  %v1896_v33 = vand.u32 (%p147_p0), 4294901760, %v506_v21 }
 0x169   : > { %vm486_vm2 = vmor %vm484_vm0, %vm485_vm1 }
 0x16a   : > { %v481_v34 = vsub.f32 1.0, %v480_v25  ;;  %v1901_v25 = vand.u32 (%p147_p0), 4294901760, %v1875_v19 }
 0x16c   : > { %v482_v35 = vmul.f32 %v1209_v38, %v481_v34  ;;  %v638_v53 = vsub.f32 (%p147_p0), %v1875_v19, %v1901_v25 }
 0x16e   : > { %v483_v37 = vadd.f32 %v1209_v38, %v482_v35  ;;  %v648_v35 = vsub.f32 (%p147_p0), %v507_v17, %v1884_v29  ;;  %v639_v10 = vand.u32 (%p147_p0), 4294901760, %v638_v53 }
 0x170   : > { %v487_v39 = vsel %vm486_vm2, %v1209_v38, %v483_v37  ;;  %149 = sbr.rel (!%p147_p0) target bundleno = 224 (0xe0), region = 58  ;;  %v626_v38 = vsub.f32 (%p147_p0), %v624_v63, %v1877_v20  ;;  %v621_v37 = vand.u32 (%p147_p0), 4294901760, %v620_v30  ;;  %v1934_v24 = vand.u32 (%p147_p0), 4294901760, %v648_v35 }
 0x171   : > { %v492_v40 = vsel %vm489_vm3, %v491_v36, %v487_v39  ;;  %v1908_v36 = vand.u32 (%p147_p0), 4294901760, %v505_v14  ;;  %v632_v39 = vsub.f32 (%p147_p0), %v1862_v7, %v1889_v31 }
 0x172   : > { %494 = vst [vmem:[%s493_s7] sm:$0xff] %v492_v40  ;;  %v495_v41 = vmul.f32 %v492_v40, %v1525_v4  ;;  %v515_v4 = vld [vmem:[%s2290_s13 + $0x68] sm:$0xff] (%p147_p0)  ;;  %v627_v52 = vand.u32 (%p147_p0), 4294901760, %v626_v38  ;;  %v650_v2 = vsub.f32 (%p147_p0), %v648_v35, %v1934_v24 }
 0x173   :  { %v1800_v51 = vand.u32 (%p147_p0), 4294901760, %v515_v4  ;;  %v503_v40 = vld [vmem:[%s2290_s13 + $0x8] sm:$0xff] (%p147_p0)  ;;  %v660_v49 = vsub.f32 (%p147_p0), %v505_v14, %v1908_v36 }
 0x174   : > { %497 = vst [vmem:[%s496_s12] sm:$0xff] %v495_v41  ;;  %v654_v41 = vsub.f32 (%p147_p0), %v506_v21, %v1896_v33  ;;  %v1932_v56 = vand.u32 (%p147_p0), 4294901760, %v503_v40 }
 0x175   :  { %v600_v46 = vsub.f32 %v515_v4, %v1800_v51  ;;  %527 = vmatpush.msra.mxu0 %v1800_v51  ;;  %774 = vmatpush.msra.mxu3 %v1800_v51 }
 0x177   :  { %v1843_v61 = vand.u32 4294901760, %v600_v46  ;;  %529 = vmatpush.msra.mxu0 %v1811_v54  ;;  %708 = vmatpush.msra.mxu2 %v600_v46 }
 0x178   :  { %776 = vmatpush.msra.mxu3 %v1811_v54 }
 0x179   :  { %v602_v6 = vsub.f32 %v600_v46, %v1843_v61  ;;  %531 = vmatpush.msra.mxu0 %v1813_v55  ;;  %711 = vmatpush.msra.mxu2 %v606_v58  ;;  %v633_v46 = vand.u32 4294901760, %v632_v39  ;;  %v666_v58 = vsub.f32 %v504_v9, %v1918_v42 }
 0x17a   :  { %778 = vmatpush.msra.mxu3 %v1813_v55 }
 0x17b   :  { %v603_v23 = vand.u32 4294901760, %v602_v6  ;;  %533 = vmatpush.msra.mxu0 %v1815_v57  ;;  %714 = vmatpush.msra.mxu2 %v612_v59  ;;  %v498_v34 = vld [vmem:[#allocation2] sm:$0xff]  ;;  %v1944_v59 = vand.u32 4294901760, %v502_v48  ;;  %v672_v6 = vsub.f32 %v503_v40, %v1932_v56  ;;  %v501_v22 = vld [vmem:[#allocation2 + $0x18] sm:$0xff] }
 0x17c   :  { %780 = vmatpush.msra.mxu3 %v1815_v57  ;;  %v1922_v4 = vand.u32 4294901760, %v498_v34 }
 0x17d   :  { %535 = vmatpush.msra.mxu0 %v1828_v12  ;;  %604 = vmatpush.msra.mxu1 %v603_v23  ;;  %v678_v18 = vsub.f32 %v502_v48, %v1944_v59  ;;  %v651_v23 = vand.u32 4294901760, %v650_v2  ;;  %v1968_v30 = vand.u32 4294901760, %v672_v6 }
 0x17e   :  { %717 = vmatpush.msra.mxu2 %v618_v16  ;;  %782 = vmatpush.msra.mxu3 %v1828_v12  ;;  %v1937_v44 = vsub.f32 %v498_v34, %v1922_v4  ;;  %v1946_v16 = vand.u32 4294901760, %v654_v41  ;;  %v500_v34 = vld [vmem:[#allocation2 + $0x10] sm:$0xff] }
 0x17f   :  { %537 = vmatpush.msra.mxu0 %v1836_v27  ;;  %610 = vmatpush.msra.mxu1 %v609_v26  ;;  %v1974_v38 = vand.u32 4294901760, %v678_v18 }
 0x180   :  { %720 = vmatpush.msra.mxu2 %v624_v63  ;;  %784 = vmatpush.msra.mxu3 %v1836_v27  ;;  %v499_v63 = vld [vmem:[#allocation2 + $0x8] sm:$0xff]  ;;  %v556_v45 = vand.u32 4294901760, %v1937_v44  ;;  %v656_v15 = vsub.f32 %v654_v41, %v1946_v16 }
 0x181   :  { %539 = vmatpush.msra.mxu0 %v1849_v1  ;;  %616 = vmatpush.msra.mxu1 %v615_v32  ;;  %v1957_v17 = vand.u32 4294901760, %v499_v63  ;;  %v680_v40 = vsub.f32 %v678_v18, %v1974_v38 }
 0x182   :  { %723 = vmatpush.msra.mxu2 %v1862_v7  ;;  %786 = vmatpush.msra.mxu3 %v1849_v1  ;;  %v1954_v7 = vand.u32 4294901760, %v660_v49  ;;  %v557_v21 = vsub.f32 %v1937_v44, %v556_v45  ;;  %v657_v26 = vand.u32 4294901760, %v656_v15 }
 0x183   :  { %541 = vmatpush.msra.mxu0 %v1871_v11  ;;  %622 = vmatpush.msra.mxu1 %v621_v37  ;;  %v563_v14 = vsub.f32 %v499_v63, %v1957_v17  ;;  %v681_v48 = vand.u32 4294901760, %v680_v40 }
 0x184   :  { %726 = vmatpush.msra.mxu2 %v1875_v19  ;;  %788 = vmatpush.msra.mxu3 %v1871_v11  ;;  %v1962_v19 = vand.u32 4294901760, %v666_v58  ;;  %v662_v28 = vsub.f32 %v660_v49, %v1954_v7  ;;  %v558_v9 = vand.u32 4294901760, %v557_v21 }
 0x185   :  { %543 = vmatpush.msra.mxu0 %v1884_v29  ;;  %628 = vmatpush.msra.mxu1 %v627_v52  ;;  %v564_v37 = vand.u32 4294901760, %v563_v14 }
 0x186   :  { %729 = vmatpush.msra.mxu2 %v642_v13  ;;  %790 = vmatpush.msra.mxu3 %v1884_v29  ;;  %v668_v13 = vsub.f32 %v666_v58, %v1962_v19  ;;  %v663_v32 = vand.u32 4294901760, %v662_v28 }
 0x187   :  { %545 = vmatpush.msra.mxu0 %v1896_v33  ;;  %634 = vmatpush.msra.mxu1 %v633_v46  ;;  %v565_v53 = vsub.f32 %v563_v14, %v564_v37 }
 0x188   :  { %732 = vmatpush.msra.mxu2 %v648_v35  ;;  %792 = vmatpush.msra.mxu3 %v1896_v33  ;;  %v674_v35 = vsub.f32 %v672_v6, %v1968_v30  ;;  %v669_v39 = vand.u32 4294901760, %v668_v13 }
 0x189   :  { %547 = vmatpush.msra.mxu0 %v1908_v36  ;;  %640 = vmatpush.msra.mxu1 %v639_v10  ;;  %v566_v46 = vand.u32 4294901760, %v565_v53 }
 0x18a   :  { %735 = vmatpush.msra.mxu2 %v654_v41  ;;  %794 = vmatpush.msra.mxu3 %v1908_v36  ;;  %v1982_v41 = vand.u32 4294901760, %v500_v34  ;;  %v675_v52 = vand.u32 4294901760, %v674_v35 }
 0x18b   :  { %549 = vmatpush.msra.mxu0 %v1918_v42  ;;  %646 = vmatpush.msra.mxu1 %v645_v43 }
 0x18c   :  { %738 = vmatpush.msra.mxu2 %v660_v49  ;;  %796 = vmatpush.msra.mxu3 %v1918_v42  ;;  %v571_v49 = vsub.f32 %v500_v34, %v1982_v41 }
 0x18d   :  { %551 = vmatpush.msra.mxu0 %v1932_v56  ;;  %652 = vmatpush.msra.mxu1 %v651_v23 }
 0x18e   :  { %741 = vmatpush.msra.mxu2 %v666_v58  ;;  %798 = vmatpush.msra.mxu3 %v1932_v56 }
 0x18f   :  { %553 = vmatpush.msra.mxu0 %v1944_v59  ;;  %658 = vmatpush.msra.mxu1 %v657_v26 }
 0x190   :  { %744 = vmatpush.msra.mxu2 %v672_v6  ;;  %559 = vmatmul.f32.vlgmr.msra.gmra.mxu0 %v558_v9 }
 0x191   :  { %664 = vmatpush.msra.mxu1 %v663_v32  ;;  %829 = vmatpush.msrb.mxu0 %v1839_v60 }
 0x192   :  { %747 = vmatpush.msra.mxu2 %v678_v18  ;;  %800 = vmatpush.msra.mxu3 %v1944_v59 }
 0x193   :  { %750 = vmatmul.f32.vlgmr.msra.gmra.mxu2 %v1937_v44  ;;  %670 = vmatpush.msra.mxu1 %v669_v39  ;;  %v572_v44 = vand.u32 4294901760, %v571_v49 }
 0x194   :  { %1165 = vmatpush.msrb.mxu2 %v1839_v60  ;;  %833 = vmatpush.msrb.mxu0 %v1841_v5  ;;  %v1997_v60 = vand.u32 4294901760, %v501_v22 }
 0x195   :  { %804 = vmatmul.f32.vlgmr.msra.gmra.mxu3 %v556_v45  ;;  %676 = vmatpush.msra.mxu1 %v675_v52 }
 0x196   :  { %1166 = vmatpush.msrb.mxu2 %v1841_v5  ;;  %1181 = vmatpush.msrb.mxu3 %v1796_v0  ;;  %v573_v5 = vsub.f32 %v571_v49, %v572_v44 }
 0x197   :  { %837 = vmatpush.msrb.mxu0 %v1843_v61  ;;  %682 = vmatpush.msra.mxu1 %v681_v48 }
 0x198   :  { %1167 = vmatpush.msrb.mxu2 %v1843_v61  ;;  %1182 = vmatpush.msrb.mxu3 %v1798_v50  ;;  %v579_v61 = vsub.f32 %v501_v22, %v1997_v60 }
 0x199   :  { %841 = vmatpush.msrb.mxu0 %v1846_v62  ;;  %684 = vmatmul.f32.vlgmr.msra.gmra.mxu1 %v1922_v4 }
 0x19a   :  { %567 = vmatmul.f32.gmra.mxu0 %v566_v46  ;;  %1168 = vmatpush.msrb.mxu2 %v1846_v62  ;;  %v574_v62 = vand.u32 4294901760, %v573_v5 }
 0x19b   :  { %1183 = vmatpush.msrb.mxu3 %v1800_v51  ;;  %845 = vmatpush.msrb.mxu0 %v1858_v3 }
 0x19c   :  { %908 = vmatpush.msrb.mxu1 %v1796_v0  ;;  %755 = vmatmul.f32.gmra.mxu2 %v563_v14  ;;  %v580_v0 = vand.u32 4294901760, %v579_v61 }
 0x19d   :  { %1169 = vmatpush.msrb.mxu2 %v1858_v3  ;;  %1184 = vmatpush.msrb.mxu3 %v1811_v54 }
 0x19e   :  { %849 = vmatpush.msrb.mxu0 %v1864_v8  ;;  %910 = vmatpush.msrb.mxu1 %v1798_v50  ;;  %v581_v50 = vsub.f32 %v579_v61, %v580_v0 }
 0x19f   :  { %810 = vmatmul.f32.gmra.mxu3 %v564_v37  ;;  %1170 = vmatpush.msrb.mxu2 %v1864_v8 }
 0x1a0   :  { %1185 = vmatpush.msrb.mxu3 %v1813_v55  ;;  %853 = vmatpush.msrb.mxu0 %v1877_v20 }
 0x1a1   :  { %912 = vmatpush.msrb.mxu1 %v1800_v51  ;;  %1171 = vmatpush.msrb.mxu2 %v1877_v20  ;;  %v582_v51 = vand.u32 4294901760, %v581_v50 }
 0x1a2   :  { %1186 = vmatpush.msrb.mxu3 %v1815_v57  ;;  %857 = vmatpush.msrb.mxu0 %v1889_v31 }
 0x1a3   :  { %914 = vmatpush.msrb.mxu1 %v1811_v54  ;;  %575 = vmatmul.f32.gmra.mxu0 %v574_v62 }
 0x1a4   :  { %688 = vmatmul.f32.gmra.mxu1 %v1957_v17  ;;  %1172 = vmatpush.msrb.mxu2 %v1889_v31 }
 0x1a5   :  { %1187 = vmatpush.msrb.mxu3 %v1828_v12  ;;  %861 = vmatpush.msrb.mxu0 %v1901_v25 }
 0x1a6   :  { %916 = vmatpush.msrb.mxu1 %v1813_v55  ;;  %760 = vmatmul.f32.gmra.mxu2 %v571_v49 }
 0x1a7   :  { %1173 = vmatpush.msrb.mxu2 %v1901_v25  ;;  %1188 = vmatpush.msrb.mxu3 %v1836_v27 }
 0x1a8   :  { %865 = vmatpush.msrb.mxu0 %v1920_v47  ;;  %918 = vmatpush.msrb.mxu1 %v1815_v57 }
 0x1a9   :  { %816 = vmatmul.f32.gmra.mxu3 %v572_v44  ;;  %1174 = vmatpush.msrb.mxu2 %v1920_v47 }
 0x1aa   :  { %1189 = vmatpush.msrb.mxu3 %v1849_v1  ;;  %869 = vmatpush.msrb.mxu0 %v1934_v24 }
 0x1ab   :  { %920 = vmatpush.msrb.mxu1 %v1828_v12  ;;  %1175 = vmatpush.msrb.mxu2 %v1934_v24 }
 0x1ac   :  { %1190 = vmatpush.msrb.mxu3 %v1871_v11  ;;  %873 = vmatpush.msrb.mxu0 %v1946_v16 }
 0x1ad   :  { %922 = vmatpush.msrb.mxu1 %v1836_v27  ;;  %583 = vmatmul.f32.gmra.mxu0 %v582_v51 }
 0x1ae   :  { %692 = vmatmul.f32.gmra.mxu1 %v1982_v41  ;;  %1176 = vmatpush.msrb.mxu2 %v1946_v16 }
 0x1af   :  { %1191 = vmatpush.msrb.mxu3 %v1884_v29  ;;  %877 = vmatpush.msrb.mxu0 %v1954_v7 }
 0x1b0   :  { %924 = vmatpush.msrb.mxu1 %v1849_v1  ;;  %765 = vmatmul.f32.gmra.mxu2 %v579_v61 }
 0x1b1   :  { %1177 = vmatpush.msrb.mxu2 %v1954_v7  ;;  %1192 = vmatpush.msrb.mxu3 %v1896_v33 }
 0x1b2   :  { %881 = vmatpush.msrb.mxu0 %v1962_v19  ;;  %926 = vmatpush.msrb.mxu1 %v1871_v11 }
 0x1b3   :  { %822 = vmatmul.f32.gmra.mxu3 %v580_v0  ;;  %1178 = vmatpush.msrb.mxu2 %v1962_v19 }
 0x1b4   :  { %1193 = vmatpush.msrb.mxu3 %v1908_v36  ;;  %885 = vmatpush.msrb.mxu0 %v1968_v30 }
 0x1b5   :  { %928 = vmatpush.msrb.mxu1 %v1884_v29  ;;  %1179 = vmatpush.msrb.mxu2 %v1968_v30  ;;  %v1210_v29 = vld [vmem:[%s2291_s5] ss:$0 sm:$0xff] }
 0x1b6   :  { %1194 = vmatpush.msrb.mxu3 %v1918_v42  ;;  %889 = vmatpush.msrb.mxu0 %v1974_v38 }
 0x1b7   :  { %930 = vmatpush.msrb.mxu1 %v1896_v33  ;;  %1180 = vmatpush.msrb.mxu2 %v1974_v38 }
 0x1b8   :  { %696 = vmatmul.f32.gmra.mxu1 %v1997_v60  ;;  %891 = vmatmul.f32.vlgmr.msrb.gmra.mxu0 %v1922_v4 }
 0x1b9   :  { %1195 = vmatpush.msrb.mxu3 %v1932_v56  ;;  %932 = vmatpush.msrb.mxu1 %v1908_v36 }
 0x1ba   :  { %899 = vmatmul.f32.vlgmr.msrb.gmra.mxu2 %v1982_v41 }
 0x1bb   :  { %1196 = vmatpush.msrb.mxu3 %v1944_v59  ;;  %934 = vmatpush.msrb.mxu1 %v1918_v42 }
 0x1bc   :  { %948 = vmatmul.f32.vlgmr.msrb.gmra.mxu3 %v1982_v41 }
 0x1bd   :  { %936 = vmatpush.msrb.mxu1 %v1932_v56 }
 0x1bf   :  { %938 = vmatpush.msrb.mxu1 %v1944_v59 }
 0x1c0   :  { %895 = vmatmul.f32.gmra.mxu0 %v1957_v17  ;;  %940 = vmatmul.f32.vlgmr.msrb.gmra.mxu1 %v1922_v4 }
 0x1c2   :  { %903 = vmatmul.f32.gmra.mxu2 %v1997_v60 }
 0x1c4   :  { %952 = vmatmul.f32.gmra.mxu3 %v1997_v60 }
 0x1c8   :  { %944 = vmatmul.f32.gmra.mxu1 %v1957_v17 }
 0x20d   :  { %v560_v54 = vpop.f32.mrf.mxu0 }
 0x20e   :  { %v561_v36 = vadd.f32 %v1210_v29, %v560_v54 }
 0x216   :  { %v751_v55 = vpop.f32.mrf.mxu2  ;;  %v685_v57 = vpop.f32.mrf.mxu1 }
 0x217   :  { %v568_v27 = vpop.f32.mrf.mxu0  ;;  %v686_v47 = vadd.f32 %v685_v57, %v561_v36 }
 0x218   :  { %v805_v12 = vpop.f32.mrf.mxu3  ;;  %v569_v59 = vadd.f32 %v1210_v29, %v568_v27 }
 0x219   :  { %v752_v16 = vadd.f32 %v751_v55, %v686_v47 }
 0x21b   :  { %v806_v2 = vadd.f32 %v805_v12, %v752_v16 }
 0x21f   :  { %v756_v1 = vpop.f32.mrf.mxu2 }
 0x220   :  { %v576_v11 = vpop.f32.mrf.mxu0 }
 0x221   :  { %v689_v3 = vpop.f32.mrf.mxu1  ;;  %v577_v42 = vadd.f32 %v1210_v29, %v576_v11 }
 0x222   :  { %v811_v8 = vpop.f32.mrf.mxu3  ;;  %v690_v6 = vadd.f32 %v689_v3, %v569_v59 }
 0x224   :  { %v757_v21 = vadd.f32 %v756_v1, %v690_v6 }
 0x226   :  { %v812_v9 = vadd.f32 %v811_v8, %v757_v21 }
 0x229   :  { %v761_v20 = vpop.f32.mrf.mxu2 }
 0x22a   :  { %v584_v25 = vpop.f32.mrf.mxu0 }
 0x22b   :  { %v693_v31 = vpop.f32.mrf.mxu1  ;;  %v585_v63 = vadd.f32 %v1210_v29, %v584_v25 }
 0x22c   :  { %v817_v33 = vpop.f32.mrf.mxu3  ;;  %v694_v56 = vadd.f32 %v693_v31, %v577_v42 }
 0x22e   :  { %v762_v45 = vadd.f32 %v761_v20, %v694_v56 }
 0x230   :  { %v818_v7 = vadd.f32 %v817_v33, %v762_v45 }
 0x233   :  { %v766_v4 = vpop.f32.mrf.mxu2 }
 0x235   :  { %v697_v24 = vpop.f32.mrf.mxu1  ;;  %v892_v10 = vpop.f32.mrf.mxu0 }
 0x236   :  { %v823_v58 = vpop.f32.mrf.mxu3  ;;  %v698_v17 = vadd.f32 %v697_v24, %v585_v63  ;;  %v893_v43 = vadd.f32 %v892_v10, %v806_v2 }
 0x238   :  { %v767_v30 = vadd.f32 %v766_v4, %v698_v17 }
 0x23a   :  { %v824_v32 = vadd.f32 %v823_v58, %v767_v30 }
 0x23d   :  { %v900_v15 = vpop.f32.mrf.mxu2  ;;  %v941_v19 = vpop.f32.mrf.mxu1 }
 0x23e   :  { %v901_v18 = vadd.f32 %v900_v15, %v818_v7  ;;  %v942_v23 = vadd.f32 %v941_v19, %v893_v43  ;;  %v896_v13 = vpop.f32.mrf.mxu0 }
 0x23f   :  { %v949_v28 = vpop.f32.mrf.mxu3  ;;  %v897_v37 = vadd.f32 %v896_v13, %v812_v9 }
 0x240   :  { %v950_v14 = vadd.f32 %v949_v28, %v901_v18  ;;  %v956_v26 = vsub.f32 0.0, %v942_v23 }
 0x242   :  { %v958_v38 = vsub.f32 0.0, %v950_v14  ;;  %v960_v34 = vmul.f32 1.442695, %v956_v26 }
 0x244   :  { %v964_v35 = vmul.f32 1.442695, %v958_v38  ;;  %1211 = vpow2.f32 %v960_v34 }
 0x245   :  { %v904_v39 = vpop.f32.mrf.mxu2  ;;  %v945_v41 = vpop.f32.mrf.mxu1 }
 0x246   :  { %1213 = vpow2.f32 %v964_v35  ;;  %v905_v40 = vadd.f32 %v904_v39, %v824_v32  ;;  %v946_v52 = vadd.f32 %v945_v41, %v897_v37 }
 0x247   :  { %v953_v53 = vpop.f32.mrf.mxu3 }
 0x248   :  { %v954_v48 = vadd.f32 %v953_v53, %v905_v40  ;;  %v957_v49 = vsub.f32 0.0, %v946_v52 }
 0x24a   :  { %v959_v46 = vsub.f32 0.0, %v954_v48  ;;  %v1212_v22 = vpop.eup %1211  ;;  %v962_v44 = vmul.f32 1.442695, %v957_v49 }
 0x24b   :  { %v968_v5 = vadd.f32 1.0, %v1212_v22 }
 0x24c   :  { %v1214_v60 = vpop.eup %1213  ;;  %v966_v61 = vmul.f32 1.442695, %v959_v46  ;;  %1215 = vpow2.f32 %v962_v44 }
 0x24d   :  { %v970_v62 = vadd.f32 1.0, %v1214_v60  ;;  %1217 = vrcp.f32 %v968_v5  ;;  %v981_v3 = vand.u32 2147483647, %v968_v5  ;;  %v983_v8 = vand.u32 2147483648, %v968_v5 }
 0x24e   :  { %vm977_vm6 = vweird.f32 %v968_v5 }
 0x24f   :  { %1219 = vrcp.f32 %v970_v62  ;;  %v1011_v29 = vand.u32 2147483648, %v970_v62  ;;  %v1009_v33 = vand.u32 2147483647, %v970_v62  ;;  %v984_v42 = vor.u32 1.1754944e-38, %v983_v8 }
 0x250   :  { %1221 = vpow2.f32 %v966_v61  ;;  %vm1005_vm8 = vweird.f32 %v970_v62  ;;  %vm982_vm9 = vcmp.eq.f32.partialorder %v981_v3, 8.507059e+37 }
 0x251   :  { %v1012_v56 = vor.u32 1.1754944e-38, %v1011_v29  ;;  %vm1010_vm11 = vcmp.eq.f32.partialorder %v1009_v33, 8.507059e+37 }
 0x252   :  { %v1216_v0 = vpop.eup %1215 }
 0x253   :  { %v1218_v50 = vpop.eup %1217  ;;  %v969_v51 = vadd.f32 1.0, %v1216_v0 }
 0x254   :  { %v973_v55 = vmul.f32 %v1218_v50, %v968_v5  ;;  %vm978_vm4 = vweird.f32 %v1218_v50 }
 0x255   :  { %v1220_v54 = vpop.eup %1219  ;;  %1223 = vrcp.f32 %v969_v51  ;;  %vm979_vm7 = vmor %vm977_vm6, %vm978_vm4  ;;  %v997_v10 = vand.u32 2147483648, %v969_v51  ;;  %v995_v7 = vand.u32 2147483647, %v969_v51  ;;  %vm991_vm13 = vweird.f32 %v969_v51 }
 0x256   :  { %v1222_v57 = vpop.eup %1221  ;;  %v1001_v12 = vmul.f32 %v1220_v54, %v970_v62  ;;  %v974_v27 = vsub.f32 1.0, %v973_v55  ;;  %vm1006_vm5 = vweird.f32 %v1220_v54 }
 0x257   :  { %v971_v1 = vadd.f32 1.0, %v1222_v57  ;;  %vm1007_vm10 = vmor %vm1005_vm8, %vm1006_vm5  ;;  %v998_v18 = vor.u32 1.1754944e-38, %v997_v10  ;;  %vm996_vm0 = vcmp.eq.f32.partialorder %v995_v7, 8.507059e+37 }
 0x258   :  { %v1002_v11 = vsub.f32 1.0, %v1001_v12  ;;  %v975_v20 = vmul.f32 %v1218_v50, %v974_v27 }
 0x259   :  { %1225 = vrcp.f32 %v971_v1  ;;  %v1025_v15 = vand.u32 2147483648, %v971_v1  ;;  %v1023_v21 = vand.u32 2147483647, %v971_v1  ;;  %vm1019_vm1 = vweird.f32 %v971_v1 }
 0x25a   :  { %v1003_v31 = vmul.f32 %v1220_v54, %v1002_v11  ;;  %v976_v25 = vadd.f32 %v1218_v50, %v975_v20 }
 0x25b   :  { %v1224_v36 = vpop.eup %1223  ;;  %v1026_v14 = vor.u32 1.1754944e-38, %v1025_v15  ;;  %vm1024_vm3 = vcmp.eq.f32.partialorder %v1023_v21, 8.507059e+37 }
 0x25c   :  { %v1004_v47 = vadd.f32 %v1220_v54, %v1003_v31  ;;  %v980_v4 = vsel %vm979_vm7, %v1218_v50, %v976_v25  ;;  %v987_v24 = vmul.f32 %v1224_v36, %v969_v51  ;;  %vm992_vm12 = vweird.f32 %v1224_v36 }
 0x25d   :  { %v985_v58 = vsel %vm982_vm9, %v984_v42, %v980_v4  ;;  %vm993_vm14 = vmor %vm991_vm13, %vm992_vm12 }
 0x25e   :  { %v1008_v59 = vsel %vm1007_vm10, %v1220_v54, %v1004_v47  ;;  %1028 = vst [vmem:[%s2292_s14] sm:$0xff] %v985_v58  ;;  %v988_v45 = vsub.f32 1.0, %v987_v24 }
 0x25f   :  { %v1226_v16 = vpop.eup %1225  ;;  %v1013_v63 = vsel %vm1010_vm11, %v1012_v56, %v1008_v59 }
 0x260   :  { %1030 = vst [vmem:[%s2292_s14 + $0x10] sm:$0xff] %v1013_v63  ;;  %v1015_v2 = vmul.f32 %v1226_v16, %v971_v1  ;;  %v989_v6 = vmul.f32 %v1224_v36, %v988_v45  ;;  %vm1020_vm15 = vweird.f32 %v1226_v16 }
 0x261   :  { %vm1021_vm2 = vmor %vm1019_vm1, %vm1020_vm15 }
 0x262   :  { %v1016_v17 = vsub.f32 1.0, %v1015_v2  ;;  %v990_v43 = vadd.f32 %v1224_v36, %v989_v6 }
 0x264   :  { %v1017_v19 = vmul.f32 %v1226_v16, %v1016_v17  ;;  %v994_v23 = vsel %vm993_vm14, %v1224_v36, %v990_v43 }
 0x265   :  { %v999_v28 = vsel %vm996_vm0, %v998_v18, %v994_v23 }
 0x266   :  { %v1018_v30 = vadd.f32 %v1226_v16, %v1017_v19  ;;  %1029 = vst [vmem:[%s2292_s14 + $0x8] sm:$0xff] %v999_v28 }
 0x268   :  { %v1022_v26 = vsel %vm1021_vm2, %v1226_v16, %v1018_v30 }
 0x269   :  { %v1027_v13 = vsel %vm1024_vm3, %v1026_v14, %v1022_v26 }
 0x26a   :  { %1031 = vst [vmem:[%s2292_s14 + $0x18] sm:$0xff] %v1027_v13 }
 0x26b   :  { %1040 = vsyncpa [#allocation4], 1 }

</bundles_post_ra>
